<compile_context>
chip_gen: v5e
topology: v5e:2x2
jax: 0.10.0
libtpu: 0.0.40
codegen_flags: <defaults>
</compile_context>

<pallas_src>
import math

import jax
import jax.numpy as jnp
from jax import lax
from jax.experimental import pallas as pl
from jax.experimental.pallas import tpu as pltpu

# ---------------- model config (small, consistent with the module) ----------------
N_TOKENS = [6, 5, 4, 3]          # encoding['n_tokens'] per field
N_FIELDS = len(N_TOKENS)         # len(encoding['dimensions'])
DIM = 32                         # attn_layers.dim == emb_dim
MAX_SEQ_LEN = 8
DEPTH = 2
HEADS = 4
HEAD_DIM = DIM // HEADS
FF_INNER = 4 * DIM
LN_EPS = 1e-5
TOTAL_LOGITS = sum(N_TOKENS)     # 18
LOGITS_PAD = 128                 # lane-dense padded head output (sliced in the wrapper)


# ---------------- fused Pallas kernel: full transformer forward ----------------
def _ln(v, g, b):
    v = v.astype(jnp.float32)
    mu = jnp.mean(v, axis=-1, keepdims=True)
    vc = v - mu
    var = jnp.mean(vc * vc, axis=-1, keepdims=True)
    return vc * lax.rsqrt(var + LN_EPS) * g + b


def _fused_forward_kernel(x_ref,
                          ln1_g_ref, ln1_b_ref, wqkv_ref, bqkv_ref, wo_ref, bo_ref,
                          ln2_g_ref, ln2_b_ref, w1_ref, b1_ref, w2_ref, b2_ref,
                          nf_g_ref, nf_b_ref, wh_ref, bh_ref,
                          out_ref):
    S = x_ref.shape[1]
    x = x_ref[0].astype(jnp.float32)                         # (S, DIM)
    scale = jnp.float32(1.0 / math.sqrt(HEAD_DIM))

    row = lax.broadcasted_iota(jnp.int32, (S, S), 0)
    col = lax.broadcasted_iota(jnp.int32, (S, S), 1)
    causal = col <= row                                      # Decoder causal mask

    for l in range(DEPTH):                                   # static unroll; weights stay in VMEM
        # ---- pre-norm multi-head causal self-attention ----
        xn = _ln(x, ln1_g_ref[l], ln1_b_ref[l])
        qkv = jnp.dot(xn, wqkv_ref[l], preferred_element_type=jnp.float32) + bqkv_ref[l]
        heads = []
        for h in range(HEADS):                               # static unroll over heads (no HBM transposes)
            q = qkv[:, h * HEAD_DIM:(h + 1) * HEAD_DIM]
            k = qkv[:, DIM + h * HEAD_DIM:DIM + (h + 1) * HEAD_DIM]
            v = qkv[:, 2 * DIM + h * HEAD_DIM:2 * DIM + (h + 1) * HEAD_DIM]
            s = jnp.dot(q, k.T, preferred_element_type=jnp.float32) * scale
            s = jnp.where(causal, s, jnp.float32(-1e30))
            s = s - jnp.max(s, axis=-1, keepdims=True)
            p = jnp.exp(s)
            p = p * pl.reciprocal(jnp.sum(p, axis=-1, keepdims=True), approx=True)
            heads.append(jnp.dot(p, v, preferred_element_type=jnp.float32))
        attn = jnp.concatenate(heads, axis=-1)               # (S, DIM) head merge, in-register
        x = x + jnp.dot(attn, wo_ref[l], preferred_element_type=jnp.float32) + bo_ref[l]

        # ---- pre-norm feed-forward ----
        xn = _ln(x, ln2_g_ref[l], ln2_b_ref[l])
        # TODO(synk): torch nn.GELU defaults to the exact erf GELU; using the tanh
        # approximation here for guaranteed Mosaic lowering.
        h1 = jax.nn.gelu(
            jnp.dot(xn, w1_ref[l], preferred_element_type=jnp.float32) + b1_ref[l],
            approximate=True)
        x = x + jnp.dot(h1, w2_ref[l], preferred_element_type=jnp.float32) + b2_ref[l]

    # ---- final LayerNorm + all per-field logit heads as one lane-dense matmul ----
    xf = _ln(x, nf_g_ref[...], nf_b_ref[...])
    out = jnp.dot(xf, wh_ref[...], preferred_element_type=jnp.float32) + bh_ref[...]
    out_ref[0] = out.astype(out_ref.dtype)


def fused_transformer(x_emb, p):
    """x_emb: (B, S, DIM) f32 -> padded logits (B, S, LOGITS_PAD) f32, one pallas_call."""
    B, S, D = x_emb.shape

    def const_spec(arr):
        nd = arr.ndim
        return pl.BlockSpec(arr.shape, lambda b, _nd=nd: (0,) * _nd)

    weight_names = ["ln1_g", "ln1_b", "wqkv", "bqkv", "wo", "bo",
                    "ln2_g", "ln2_b", "w1", "b1", "w2", "b2",
                    "norm_g", "norm_b", "wh", "bh"]
    weights = [p[n] for n in weight_names]

    return pl.pallas_call(
        _fused_forward_kernel,
        out_shape=jax.ShapeDtypeStruct((B, S, LOGITS_PAD), jnp.float32),
        grid=(B,),
        in_specs=[pl.BlockSpec((1, S, D), lambda b: (b, 0, 0))]
                 + [const_spec(w) for w in weights],
        out_specs=pl.BlockSpec((1, S, LOGITS_PAD), lambda b: (b, 0, 0)),
        compiler_params=pltpu.CompilerParams(dimension_semantics=("parallel",)),
    )(x_emb, *weights)


# ---------------- model wrapper (embedding gather is glue, everything else in the kernel) ----------------
def _embed(p, tokens):
    B, S, F = tokens.shape
    x = jnp.zeros((B, S, DIM), jnp.float32)
    for i in range(F):
        tbl = p["tok_emb"][i]                                # (n_tokens[i], DIM)
        idx = jnp.clip(tokens[..., i], 0, tbl.shape[0] - 1)  # matches torch.clamp in forward()
        x = x + jnp.take(tbl, idx, axis=0)
    # absolute positional embedding, scaled by dim**-0.5 (x_transformers)
    x = x + p["pos_emb"][:S][None, :, :] * (DIM ** -0.5)
    # emb_dropout(p=0.0) -> identity ; project_embedding -> Identity (emb_dim == dim)
    return x


def forward(p, tokens):
    """tokens: (B, S, N_FIELDS) int32 -> list of per-field logits [(B, S, n_i)]."""
    x = _embed(p, tokens)
    padded = fused_transformer(x, p)                         # (B, S, LOGITS_PAD)
    logits, off = [], 0
    for n in N_TOKENS:
        logits.append(padded[..., off:off + n])
        off += n
    return logits


# ---------------- pure-JAX reference (same math) for a numeric sanity check ----------------
def reference_padded(p, tokens):
    B, S, _ = tokens.shape
    x = _embed(p, tokens)
    scale = 1.0 / math.sqrt(HEAD_DIM)
    causal = jnp.tril(jnp.ones((S, S), bool))
    for l in range(DEPTH):
        xn = _ln(x, p["ln1_g"][l], p["ln1_b"][l])
        qkv = xn @ p["wqkv"][l] + p["bqkv"][l]
        q, k, v = jnp.split(qkv, 3, axis=-1)

        def sh(t):
            return t.reshape(B, S, HEADS, HEAD_DIM).transpose(0, 2, 1, 3)

        q, k, v = sh(q), sh(k), sh(v)
        s = jnp.einsum("bhqd,bhkd->bhqk", q, k) * scale
        s = jnp.where(causal[None, None], s, -1e30)
        pr = jax.nn.softmax(s, axis=-1)
        o = jnp.einsum("bhqk,bhkd->bhqd", pr, v).transpose(0, 2, 1, 3).reshape(B, S, DIM)
        x = x + o @ p["wo"][l] + p["bo"][l]
        xn = _ln(x, p["ln2_g"][l], p["ln2_b"][l])
        x = x + jax.nn.gelu(xn @ p["w1"][l] + p["b1"][l], approximate=True) @ p["w2"][l] + p["b2"][l]
    xf = _ln(x, p["norm_g"], p["norm_b"])
    return xf @ p["wh"] + p["bh"]


# ---------------- deterministic parameter init (already packed / stacked) ----------------
def init_packed_params(key):
    keys = iter(jax.random.split(key, 64))

    def nrm(shape, std):
        return std * jax.random.normal(next(keys), shape, jnp.float32)

    kaiming_std = math.sqrt(2.0 / DIM)       # kaiming_normal_, fan_in = DIM
    p = {}
    p["tok_emb"] = [nrm((n, DIM), kaiming_std) for n in N_TOKENS]
    p["pos_emb"] = nrm((MAX_SEQ_LEN, DIM), 1.0)   # nn.Embedding default N(0,1)

    # per-layer weights stacked along a leading depth axis (stay VMEM-resident in the kernel)
    p["ln1_g"] = jnp.ones((DEPTH, 1, DIM), jnp.float32)
    p["ln1_b"] = jnp.zeros((DEPTH, 1, DIM), jnp.float32)
    p["wqkv"] = nrm((DEPTH, DIM, 3 * DIM), 0.02)   # fused [Wq | Wk | Wv]
    p["bqkv"] = jnp.zeros((DEPTH, 1, 3 * DIM), jnp.float32)
    p["wo"] = nrm((DEPTH, DIM, DIM), 0.02)
    p["bo"] = jnp.zeros((DEPTH, 1, DIM), jnp.float32)
    p["ln2_g"] = jnp.ones((DEPTH, 1, DIM), jnp.float32)
    p["ln2_b"] = jnp.zeros((DEPTH, 1, DIM), jnp.float32)
    p["w1"] = nrm((DEPTH, DIM, FF_INNER), 0.02)
    p["b1"] = jnp.zeros((DEPTH, 1, FF_INNER), jnp.float32)
    p["w2"] = nrm((DEPTH, FF_INNER, DIM), 0.02)
    p["b2"] = jnp.zeros((DEPTH, 1, DIM), jnp.float32)

    p["norm_g"] = jnp.ones((1, DIM), jnp.float32)
    p["norm_b"] = jnp.zeros((1, DIM), jnp.float32)

    # per-field logit heads packed into one lane-dense (DIM, 128) matmul (sliced in wrapper)
    wh = jnp.zeros((DIM, LOGITS_PAD), jnp.float32)
    bh = jnp.zeros((1, LOGITS_PAD), jnp.float32)
    off = 0
    for n in N_TOKENS:
        wh = wh.at[:, off:off + n].set(nrm((DIM, n), 0.02))
        off += n
    p["wh"] = wh
    p["bh"] = bh
    return p


if __name__ == "__main__":
    key = jax.random.PRNGKey(0)
    pkey, dkey = jax.random.split(key)
    params = init_packed_params(pkey)

    B, S = 2, MAX_SEQ_LEN
    tokens = jax.random.randint(dkey, (B, S, N_FIELDS), 0, max(N_TOKENS), dtype=jnp.int32)

    logits = jax.jit(forward)(params, tokens)
    logits = jax.block_until_ready(logits)

    # sanity: one logits tensor per encoding field with shape (B, S, n_tokens[i])
    assert len(logits) == N_FIELDS
    for li, n in zip(logits, N_TOKENS):
        assert li.shape == (B, S, n)
        assert bool(jnp.all(jnp.isfinite(li)))

    # numeric check vs pure-JAX reference (approx reciprocal -> generous tolerance)
    ref = reference_padded(params, tokens)[..., :TOTAL_LOGITS]
    got = jnp.concatenate(logits, axis=-1)
    err = float(jnp.max(jnp.abs(got - ref)))
    assert err < 1e-2, f"max abs diff vs reference: {err}"

    print("KERNEL_OK")
</pallas_src>

<mosaic_0001>
module attributes {stable_mosaic.version = 11 : i64} {
  func.func @_fused_forward_kernel(%arg0: i32, %arg1: memref<1x8x32xf32, #tpu.memory_space<vmem>>, %arg2: memref<2x1x32xf32, #tpu.memory_space<vmem>>, %arg3: memref<2x1x32xf32, #tpu.memory_space<vmem>>, %arg4: memref<2x32x96xf32, #tpu.memory_space<vmem>>, %arg5: memref<2x1x96xf32, #tpu.memory_space<vmem>>, %arg6: memref<2x32x32xf32, #tpu.memory_space<vmem>>, %arg7: memref<2x1x32xf32, #tpu.memory_space<vmem>>, %arg8: memref<2x1x32xf32, #tpu.memory_space<vmem>>, %arg9: memref<2x1x32xf32, #tpu.memory_space<vmem>>, %arg10: memref<2x32x128xf32, #tpu.memory_space<vmem>>, %arg11: memref<2x1x128xf32, #tpu.memory_space<vmem>>, %arg12: memref<2x128x32xf32, #tpu.memory_space<vmem>>, %arg13: memref<2x1x32xf32, #tpu.memory_space<vmem>>, %arg14: memref<1x32xf32, #tpu.memory_space<vmem>>, %arg15: memref<1x32xf32, #tpu.memory_space<vmem>>, %arg16: memref<32x128xf32, #tpu.memory_space<vmem>>, %arg17: memref<1x128xf32, #tpu.memory_space<vmem>>, %arg18: memref<1x8x128xf32, #tpu.memory_space<vmem>>) attributes {dimension_semantics = [#tpu.dimension_semantics<parallel>], iteration_bounds = array<i64: 2>, scalar_prefetch = 0 : i64, scratch_operands = 0 : i64, tpu.core_type = #tpu.core_type<tc>, window_params = [{transform_indices = @transform_0, window_bounds = array<i64: 1, 8, 32>}, {pipeline_mode = #tpu.pipeline_mode<synchronous>, transform_indices = @transform_1, window_bounds = array<i64: 2, 1, 32>}, {pipeline_mode = #tpu.pipeline_mode<synchronous>, transform_indices = @transform_2, window_bounds = array<i64: 2, 1, 32>}, {pipeline_mode = #tpu.pipeline_mode<synchronous>, transform_indices = @transform_3, window_bounds = array<i64: 2, 32, 96>}, {pipeline_mode = #tpu.pipeline_mode<synchronous>, transform_indices = @transform_4, window_bounds = array<i64: 2, 1, 96>}, {pipeline_mode = #tpu.pipeline_mode<synchronous>, transform_indices = @transform_5, window_bounds = array<i64: 2, 32, 32>}, {pipeline_mode = #tpu.pipeline_mode<synchronous>, transform_indices = @transform_6, window_bounds = array<i64: 2, 1, 32>}, {pipeline_mode = #tpu.pipeline_mode<synchronous>, transform_indices = @transform_7, window_bounds = array<i64: 2, 1, 32>}, {pipeline_mode = #tpu.pipeline_mode<synchronous>, transform_indices = @transform_8, window_bounds = array<i64: 2, 1, 32>}, {pipeline_mode = #tpu.pipeline_mode<synchronous>, transform_indices = @transform_9, window_bounds = array<i64: 2, 32, 128>}, {pipeline_mode = #tpu.pipeline_mode<synchronous>, transform_indices = @transform_10, window_bounds = array<i64: 2, 1, 128>}, {pipeline_mode = #tpu.pipeline_mode<synchronous>, transform_indices = @transform_11, window_bounds = array<i64: 2, 128, 32>}, {pipeline_mode = #tpu.pipeline_mode<synchronous>, transform_indices = @transform_12, window_bounds = array<i64: 2, 1, 32>}, {pipeline_mode = #tpu.pipeline_mode<synchronous>, transform_indices = @transform_13, window_bounds = array<i64: 1, 32>}, {pipeline_mode = #tpu.pipeline_mode<synchronous>, transform_indices = @transform_14, window_bounds = array<i64: 1, 32>}, {pipeline_mode = #tpu.pipeline_mode<synchronous>, transform_indices = @transform_15, window_bounds = array<i64: 32, 128>}, {pipeline_mode = #tpu.pipeline_mode<synchronous>, transform_indices = @transform_16, window_bounds = array<i64: 1, 128>}, {transform_indices = @transform_17, window_bounds = array<i64: 1, 8, 128>}]} {
    %c0 = arith.constant 0 : index
    %c0_0 = arith.constant 0 : index
    %c0_1 = arith.constant 0 : index
    %0 = vector.load %arg1[%c0, %c0_0, %c0_1] : memref<1x8x32xf32, #tpu.memory_space<vmem>>, vector<1x8x32xf32>
    %1 = vector.shape_cast %0 : vector<1x8x32xf32> to vector<8x32xf32>
    %2 = tpu.iota {dimensions = array<i32: 0>} : vector<8x8xi32>
    %3 = tpu.iota {dimensions = array<i32: 1>} : vector<8x8xi32>
    %4 = arith.cmpi sle, %3, %2 : vector<8x8xi32>
    %c0_2 = arith.constant 0 : index
    %c0_3 = arith.constant 0 : index
    %c0_4 = arith.constant 0 : index
    %5 = vector.load %arg2[%c0_2, %c0_3, %c0_4] : memref<2x1x32xf32, #tpu.memory_space<vmem>>, vector<1x1x32xf32>
    %6 = vector.shape_cast %5 : vector<1x1x32xf32> to vector<1x32xf32>
    %c0_5 = arith.constant 0 : index
    %c0_6 = arith.constant 0 : index
    %c0_7 = arith.constant 0 : index
    %7 = vector.load %arg3[%c0_5, %c0_6, %c0_7] : memref<2x1x32xf32, #tpu.memory_space<vmem>>, vector<1x1x32xf32>
    %8 = vector.shape_cast %7 : vector<1x1x32xf32> to vector<1x32xf32>
    %cst = arith.constant dense<0.000000e+00> : vector<8xf32>
    %9 = vector.multi_reduction <add>, %1, %cst [1] : vector<8x32xf32> to vector<8xf32>
    %10 = vector.shape_cast %9 : vector<8xf32> to vector<8x1xf32>
    %cst_8 = arith.constant 3.200000e+01 : f32
    %11 = vector.broadcast %cst_8 : f32 to vector<8x1xf32>
    %12 = arith.divf %10, %11 : vector<8x1xf32>
    %13 = vector.broadcast %12 : vector<8x1xf32> to vector<8x32xf32>
    %14 = arith.subf %1, %13 : vector<8x32xf32>
    %15 = arith.mulf %14, %14 : vector<8x32xf32>
    %cst_9 = arith.constant dense<0.000000e+00> : vector<8xf32>
    %16 = vector.multi_reduction <add>, %15, %cst_9 [1] : vector<8x32xf32> to vector<8xf32>
    %17 = vector.shape_cast %16 : vector<8xf32> to vector<8x1xf32>
    %cst_10 = arith.constant 3.200000e+01 : f32
    %18 = vector.broadcast %cst_10 : f32 to vector<8x1xf32>
    %19 = arith.divf %17, %18 : vector<8x1xf32>
    %cst_11 = arith.constant 9.99999974E-6 : f32
    %20 = vector.broadcast %cst_11 : f32 to vector<8x1xf32>
    %21 = arith.addf %19, %20 : vector<8x1xf32>
    %22 = math.rsqrt %21 : vector<8x1xf32>
    %23 = vector.broadcast %22 : vector<8x1xf32> to vector<8x32xf32>
    %24 = arith.mulf %14, %23 : vector<8x32xf32>
    %25 = vector.broadcast %6 : vector<1x32xf32> to vector<8x32xf32>
    %26 = arith.mulf %24, %25 : vector<8x32xf32>
    %27 = vector.broadcast %8 : vector<1x32xf32> to vector<8x32xf32>
    %28 = arith.addf %26, %27 : vector<8x32xf32>
    %c0_12 = arith.constant 0 : index
    %c0_13 = arith.constant 0 : index
    %c0_14 = arith.constant 0 : index
    %29 = vector.load %arg4[%c0_12, %c0_13, %c0_14] : memref<2x32x96xf32, #tpu.memory_space<vmem>>, vector<1x32x96xf32>
    %30 = vector.shape_cast %29 : vector<1x32x96xf32> to vector<32x96xf32>
    %cst_15 = arith.constant dense<0.000000e+00> : vector<8x96xf32>
    %31 = tpu.matmul %28, %30, %cst_15 {dimension_numbers = #tpu.dot_dimension_numbers<[1], [0], [0], [1], [0, 0, 1, 1], [], []>} : vector<8x32xf32>, vector<32x96xf32>, vector<8x96xf32> -> vector<8x96xf32>
    %c0_16 = arith.constant 0 : index
    %c0_17 = arith.constant 0 : index
    %c0_18 = arith.constant 0 : index
    %32 = vector.load %arg5[%c0_16, %c0_17, %c0_18] : memref<2x1x96xf32, #tpu.memory_space<vmem>>, vector<1x1x96xf32>
    %33 = vector.shape_cast %32 : vector<1x1x96xf32> to vector<1x96xf32>
    %34 = vector.broadcast %33 : vector<1x96xf32> to vector<8x96xf32>
    %35 = arith.addf %31, %34 : vector<8x96xf32>
    %36 = vector.extract_strided_slice %35 {offsets = [0, 0], sizes = [8, 8], strides = [1, 1]} : vector<8x96xf32> to vector<8x8xf32>
    %37 = vector.extract_strided_slice %35 {offsets = [0, 32], sizes = [8, 8], strides = [1, 1]} : vector<8x96xf32> to vector<8x8xf32>
    %38 = vector.extract_strided_slice %35 {offsets = [0, 64], sizes = [8, 8], strides = [1, 1]} : vector<8x96xf32> to vector<8x8xf32>
    %39 = tpu.transpose %37, [1, 0] : vector<8x8xf32> -> vector<8x8xf32>
    %cst_19 = arith.constant dense<0.000000e+00> : vector<8x8xf32>
    %40 = tpu.matmul %36, %39, %cst_19 {dimension_numbers = #tpu.dot_dimension_numbers<[1], [0], [0], [1], [0, 0, 1, 1], [], []>} : vector<8x8xf32>, vector<8x8xf32>, vector<8x8xf32> -> vector<8x8xf32>
    %cst_20 = arith.constant 0.353553385 : f32
    %41 = vector.broadcast %cst_20 : f32 to vector<8x8xf32>
    %42 = arith.mulf %40, %41 : vector<8x8xf32>
    %cst_21 = arith.constant -1.000000e+30 : f32
    %43 = vector.broadcast %cst_21 : f32 to vector<8x8xf32>
    %44 = arith.select %4, %42, %43 : vector<8x8xi1>, vector<8x8xf32>
    %cst_22 = arith.constant dense<0xFF800000> : vector<8xf32>
    %45 = vector.multi_reduction <maximumf>, %44, %cst_22 [1] : vector<8x8xf32> to vector<8xf32>
    %46 = vector.shape_cast %45 : vector<8xf32> to vector<8x1xf32>
    %47 = vector.broadcast %46 : vector<8x1xf32> to vector<8x8xf32>
    %48 = arith.subf %44, %47 : vector<8x8xf32>
    %49 = math.exp %48 : vector<8x8xf32>
    %cst_23 = arith.constant dense<0.000000e+00> : vector<8xf32>
    %50 = vector.multi_reduction <add>, %49, %cst_23 [1] : vector<8x8xf32> to vector<8xf32>
    %51 = vector.shape_cast %50 : vector<8xf32> to vector<8x1xf32>
    %52 = tpu.reciprocal %51 {approx = true} : vector<8x1xf32> -> vector<8x1xf32>
    %53 = vector.broadcast %52 : vector<8x1xf32> to vector<8x8xf32>
    %54 = arith.mulf %49, %53 : vector<8x8xf32>
    %cst_24 = arith.constant dense<0.000000e+00> : vector<8x8xf32>
    %55 = tpu.matmul %54, %38, %cst_24 {dimension_numbers = #tpu.dot_dimension_numbers<[1], [0], [0], [1], [0, 0, 1, 1], [], []>} : vector<8x8xf32>, vector<8x8xf32>, vector<8x8xf32> -> vector<8x8xf32>
    %56 = vector.extract_strided_slice %35 {offsets = [0, 8], sizes = [8, 8], strides = [1, 1]} : vector<8x96xf32> to vector<8x8xf32>
    %57 = vector.extract_strided_slice %35 {offsets = [0, 40], sizes = [8, 8], strides = [1, 1]} : vector<8x96xf32> to vector<8x8xf32>
    %58 = vector.extract_strided_slice %35 {offsets = [0, 72], sizes = [8, 8], strides = [1, 1]} : vector<8x96xf32> to vector<8x8xf32>
    %59 = tpu.transpose %57, [1, 0] : vector<8x8xf32> -> vector<8x8xf32>
    %cst_25 = arith.constant dense<0.000000e+00> : vector<8x8xf32>
    %60 = tpu.matmul %56, %59, %cst_25 {dimension_numbers = #tpu.dot_dimension_numbers<[1], [0], [0], [1], [0, 0, 1, 1], [], []>} : vector<8x8xf32>, vector<8x8xf32>, vector<8x8xf32> -> vector<8x8xf32>
    %cst_26 = arith.constant 0.353553385 : f32
    %61 = vector.broadcast %cst_26 : f32 to vector<8x8xf32>
    %62 = arith.mulf %60, %61 : vector<8x8xf32>
    %cst_27 = arith.constant -1.000000e+30 : f32
    %63 = vector.broadcast %cst_27 : f32 to vector<8x8xf32>
    %64 = arith.select %4, %62, %63 : vector<8x8xi1>, vector<8x8xf32>
    %cst_28 = arith.constant dense<0xFF800000> : vector<8xf32>
    %65 = vector.multi_reduction <maximumf>, %64, %cst_28 [1] : vector<8x8xf32> to vector<8xf32>
    %66 = vector.shape_cast %65 : vector<8xf32> to vector<8x1xf32>
    %67 = vector.broadcast %66 : vector<8x1xf32> to vector<8x8xf32>
    %68 = arith.subf %64, %67 : vector<8x8xf32>
    %69 = math.exp %68 : vector<8x8xf32>
    %cst_29 = arith.constant dense<0.000000e+00> : vector<8xf32>
    %70 = vector.multi_reduction <add>, %69, %cst_29 [1] : vector<8x8xf32> to vector<8xf32>
    %71 = vector.shape_cast %70 : vector<8xf32> to vector<8x1xf32>
    %72 = tpu.reciprocal %71 {approx = true} : vector<8x1xf32> -> vector<8x1xf32>
    %73 = vector.broadcast %72 : vector<8x1xf32> to vector<8x8xf32>
    %74 = arith.mulf %69, %73 : vector<8x8xf32>
    %cst_30 = arith.constant dense<0.000000e+00> : vector<8x8xf32>
    %75 = tpu.matmul %74, %58, %cst_30 {dimension_numbers = #tpu.dot_dimension_numbers<[1], [0], [0], [1], [0, 0, 1, 1], [], []>} : vector<8x8xf32>, vector<8x8xf32>, vector<8x8xf32> -> vector<8x8xf32>
    %76 = vector.extract_strided_slice %35 {offsets = [0, 16], sizes = [8, 8], strides = [1, 1]} : vector<8x96xf32> to vector<8x8xf32>
    %77 = vector.extract_strided_slice %35 {offsets = [0, 48], sizes = [8, 8], strides = [1, 1]} : vector<8x96xf32> to vector<8x8xf32>
    %78 = vector.extract_strided_slice %35 {offsets = [0, 80], sizes = [8, 8], strides = [1, 1]} : vector<8x96xf32> to vector<8x8xf32>
    %79 = tpu.transpose %77, [1, 0] : vector<8x8xf32> -> vector<8x8xf32>
    %cst_31 = arith.constant dense<0.000000e+00> : vector<8x8xf32>
    %80 = tpu.matmul %76, %79, %cst_31 {dimension_numbers = #tpu.dot_dimension_numbers<[1], [0], [0], [1], [0, 0, 1, 1], [], []>} : vector<8x8xf32>, vector<8x8xf32>, vector<8x8xf32> -> vector<8x8xf32>
    %cst_32 = arith.constant 0.353553385 : f32
    %81 = vector.broadcast %cst_32 : f32 to vector<8x8xf32>
    %82 = arith.mulf %80, %81 : vector<8x8xf32>
    %cst_33 = arith.constant -1.000000e+30 : f32
    %83 = vector.broadcast %cst_33 : f32 to vector<8x8xf32>
    %84 = arith.select %4, %82, %83 : vector<8x8xi1>, vector<8x8xf32>
    %cst_34 = arith.constant dense<0xFF800000> : vector<8xf32>
    %85 = vector.multi_reduction <maximumf>, %84, %cst_34 [1] : vector<8x8xf32> to vector<8xf32>
    %86 = vector.shape_cast %85 : vector<8xf32> to vector<8x1xf32>
    %87 = vector.broadcast %86 : vector<8x1xf32> to vector<8x8xf32>
    %88 = arith.subf %84, %87 : vector<8x8xf32>
    %89 = math.exp %88 : vector<8x8xf32>
    %cst_35 = arith.constant dense<0.000000e+00> : vector<8xf32>
    %90 = vector.multi_reduction <add>, %89, %cst_35 [1] : vector<8x8xf32> to vector<8xf32>
    %91 = vector.shape_cast %90 : vector<8xf32> to vector<8x1xf32>
    %92 = tpu.reciprocal %91 {approx = true} : vector<8x1xf32> -> vector<8x1xf32>
    %93 = vector.broadcast %92 : vector<8x1xf32> to vector<8x8xf32>
    %94 = arith.mulf %89, %93 : vector<8x8xf32>
    %cst_36 = arith.constant dense<0.000000e+00> : vector<8x8xf32>
    %95 = tpu.matmul %94, %78, %cst_36 {dimension_numbers = #tpu.dot_dimension_numbers<[1], [0], [0], [1], [0, 0, 1, 1], [], []>} : vector<8x8xf32>, vector<8x8xf32>, vector<8x8xf32> -> vector<8x8xf32>
    %96 = vector.extract_strided_slice %35 {offsets = [0, 24], sizes = [8, 8], strides = [1, 1]} : vector<8x96xf32> to vector<8x8xf32>
    %97 = vector.extract_strided_slice %35 {offsets = [0, 56], sizes = [8, 8], strides = [1, 1]} : vector<8x96xf32> to vector<8x8xf32>
    %98 = vector.extract_strided_slice %35 {offsets = [0, 88], sizes = [8, 8], strides = [1, 1]} : vector<8x96xf32> to vector<8x8xf32>
    %99 = tpu.transpose %97, [1, 0] : vector<8x8xf32> -> vector<8x8xf32>
    %cst_37 = arith.constant dense<0.000000e+00> : vector<8x8xf32>
    %100 = tpu.matmul %96, %99, %cst_37 {dimension_numbers = #tpu.dot_dimension_numbers<[1], [0], [0], [1], [0, 0, 1, 1], [], []>} : vector<8x8xf32>, vector<8x8xf32>, vector<8x8xf32> -> vector<8x8xf32>
    %cst_38 = arith.constant 0.353553385 : f32
    %101 = vector.broadcast %cst_38 : f32 to vector<8x8xf32>
    %102 = arith.mulf %100, %101 : vector<8x8xf32>
    %cst_39 = arith.constant -1.000000e+30 : f32
    %103 = vector.broadcast %cst_39 : f32 to vector<8x8xf32>
    %104 = arith.select %4, %102, %103 : vector<8x8xi1>, vector<8x8xf32>
    %cst_40 = arith.constant dense<0xFF800000> : vector<8xf32>
    %105 = vector.multi_reduction <maximumf>, %104, %cst_40 [1] : vector<8x8xf32> to vector<8xf32>
    %106 = vector.shape_cast %105 : vector<8xf32> to vector<8x1xf32>
    %107 = vector.broadcast %106 : vector<8x1xf32> to vector<8x8xf32>
    %108 = arith.subf %104, %107 : vector<8x8xf32>
    %109 = math.exp %108 : vector<8x8xf32>
    %cst_41 = arith.constant dense<0.000000e+00> : vector<8xf32>
    %110 = vector.multi_reduction <add>, %109, %cst_41 [1] : vector<8x8xf32> to vector<8xf32>
    %111 = vector.shape_cast %110 : vector<8xf32> to vector<8x1xf32>
    %112 = tpu.reciprocal %111 {approx = true} : vector<8x1xf32> -> vector<8x1xf32>
    %113 = vector.broadcast %112 : vector<8x1xf32> to vector<8x8xf32>
    %114 = arith.mulf %109, %113 : vector<8x8xf32>
    %cst_42 = arith.constant dense<0.000000e+00> : vector<8x8xf32>
    %115 = tpu.matmul %114, %98, %cst_42 {dimension_numbers = #tpu.dot_dimension_numbers<[1], [0], [0], [1], [0, 0, 1, 1], [], []>} : vector<8x8xf32>, vector<8x8xf32>, vector<8x8xf32> -> vector<8x8xf32>
    %116 = tpu.concatenate %55, %75, %95, %115 in 1 : vector<8x8xf32>, vector<8x8xf32>, vector<8x8xf32>, vector<8x8xf32> -> vector<8x32xf32>
    %c0_43 = arith.constant 0 : index
    %c0_44 = arith.constant 0 : index
    %c0_45 = arith.constant 0 : index
    %117 = vector.load %arg6[%c0_43, %c0_44, %c0_45] : memref<2x32x32xf32, #tpu.memory_space<vmem>>, vector<1x32x32xf32>
    %118 = vector.shape_cast %117 : vector<1x32x32xf32> to vector<32x32xf32>
    %cst_46 = arith.constant dense<0.000000e+00> : vector<8x32xf32>
    %119 = tpu.matmul %116, %118, %cst_46 {dimension_numbers = #tpu.dot_dimension_numbers<[1], [0], [0], [1], [0, 0, 1, 1], [], []>} : vector<8x32xf32>, vector<32x32xf32>, vector<8x32xf32> -> vector<8x32xf32>
    %120 = arith.addf %1, %119 : vector<8x32xf32>
    %c0_47 = arith.constant 0 : index
    %c0_48 = arith.constant 0 : index
    %c0_49 = arith.constant 0 : index
    %121 = vector.load %arg7[%c0_47, %c0_48, %c0_49] : memref<2x1x32xf32, #tpu.memory_space<vmem>>, vector<1x1x32xf32>
    %122 = vector.shape_cast %121 : vector<1x1x32xf32> to vector<1x32xf32>
    %123 = vector.broadcast %122 : vector<1x32xf32> to vector<8x32xf32>
    %124 = arith.addf %120, %123 : vector<8x32xf32>
    %c0_50 = arith.constant 0 : index
    %c0_51 = arith.constant 0 : index
    %c0_52 = arith.constant 0 : index
    %125 = vector.load %arg8[%c0_50, %c0_51, %c0_52] : memref<2x1x32xf32, #tpu.memory_space<vmem>>, vector<1x1x32xf32>
    %126 = vector.shape_cast %125 : vector<1x1x32xf32> to vector<1x32xf32>
    %c0_53 = arith.constant 0 : index
    %c0_54 = arith.constant 0 : index
    %c0_55 = arith.constant 0 : index
    %127 = vector.load %arg9[%c0_53, %c0_54, %c0_55] : memref<2x1x32xf32, #tpu.memory_space<vmem>>, vector<1x1x32xf32>
    %128 = vector.shape_cast %127 : vector<1x1x32xf32> to vector<1x32xf32>
    %cst_56 = arith.constant dense<0.000000e+00> : vector<8xf32>
    %129 = vector.multi_reduction <add>, %124, %cst_56 [1] : vector<8x32xf32> to vector<8xf32>
    %130 = vector.shape_cast %129 : vector<8xf32> to vector<8x1xf32>
    %cst_57 = arith.constant 3.200000e+01 : f32
    %131 = vector.broadcast %cst_57 : f32 to vector<8x1xf32>
    %132 = arith.divf %130, %131 : vector<8x1xf32>
    %133 = vector.broadcast %132 : vector<8x1xf32> to vector<8x32xf32>
    %134 = arith.subf %124, %133 : vector<8x32xf32>
    %135 = arith.mulf %134, %134 : vector<8x32xf32>
    %cst_58 = arith.constant dense<0.000000e+00> : vector<8xf32>
    %136 = vector.multi_reduction <add>, %135, %cst_58 [1] : vector<8x32xf32> to vector<8xf32>
    %137 = vector.shape_cast %136 : vector<8xf32> to vector<8x1xf32>
    %cst_59 = arith.constant 3.200000e+01 : f32
    %138 = vector.broadcast %cst_59 : f32 to vector<8x1xf32>
    %139 = arith.divf %137, %138 : vector<8x1xf32>
    %cst_60 = arith.constant 9.99999974E-6 : f32
    %140 = vector.broadcast %cst_60 : f32 to vector<8x1xf32>
    %141 = arith.addf %139, %140 : vector<8x1xf32>
    %142 = math.rsqrt %141 : vector<8x1xf32>
    %143 = vector.broadcast %142 : vector<8x1xf32> to vector<8x32xf32>
    %144 = arith.mulf %134, %143 : vector<8x32xf32>
    %145 = vector.broadcast %126 : vector<1x32xf32> to vector<8x32xf32>
    %146 = arith.mulf %144, %145 : vector<8x32xf32>
    %147 = vector.broadcast %128 : vector<1x32xf32> to vector<8x32xf32>
    %148 = arith.addf %146, %147 : vector<8x32xf32>
    %c0_61 = arith.constant 0 : index
    %c0_62 = arith.constant 0 : index
    %c0_63 = arith.constant 0 : index
    %149 = vector.load %arg10[%c0_61, %c0_62, %c0_63] : memref<2x32x128xf32, #tpu.memory_space<vmem>>, vector<1x32x128xf32>
    %150 = vector.shape_cast %149 : vector<1x32x128xf32> to vector<32x128xf32>
    %cst_64 = arith.constant dense<0.000000e+00> : vector<8x128xf32>
    %151 = tpu.matmul %148, %150, %cst_64 {dimension_numbers = #tpu.dot_dimension_numbers<[1], [0], [0], [1], [0, 0, 1, 1], [], []>} : vector<8x32xf32>, vector<32x128xf32>, vector<8x128xf32> -> vector<8x128xf32>
    %c0_65 = arith.constant 0 : index
    %c0_66 = arith.constant 0 : index
    %c0_67 = arith.constant 0 : index
    %152 = vector.load %arg11[%c0_65, %c0_66, %c0_67] : memref<2x1x128xf32, #tpu.memory_space<vmem>>, vector<1x1x128xf32>
    %153 = vector.shape_cast %152 : vector<1x1x128xf32> to vector<1x128xf32>
    %154 = vector.broadcast %153 : vector<1x128xf32> to vector<8x128xf32>
    %155 = arith.addf %151, %154 : vector<8x128xf32>
    %156 = arith.mulf %155, %155 : vector<8x128xf32>
    %157 = arith.mulf %155, %156 : vector<8x128xf32>
    %cst_68 = arith.constant 4.471500e-02 : f32
    %158 = vector.broadcast %cst_68 : f32 to vector<8x128xf32>
    %159 = arith.mulf %158, %157 : vector<8x128xf32>
    %160 = arith.addf %155, %159 : vector<8x128xf32>
    %cst_69 = arith.constant 0.797884583 : f32
    %161 = vector.broadcast %cst_69 : f32 to vector<8x128xf32>
    %162 = arith.mulf %161, %160 : vector<8x128xf32>
    %163 = math.tanh %162 : vector<8x128xf32>
    %cst_70 = arith.constant 1.000000e+00 : f32
    %164 = vector.broadcast %cst_70 : f32 to vector<8x128xf32>
    %165 = arith.addf %164, %163 : vector<8x128xf32>
    %cst_71 = arith.constant 5.000000e-01 : f32
    %166 = vector.broadcast %cst_71 : f32 to vector<8x128xf32>
    %167 = arith.mulf %166, %165 : vector<8x128xf32>
    %168 = arith.mulf %155, %167 : vector<8x128xf32>
    %c0_72 = arith.constant 0 : index
    %c0_73 = arith.constant 0 : index
    %c0_74 = arith.constant 0 : index
    %169 = vector.load %arg12[%c0_72, %c0_73, %c0_74] : memref<2x128x32xf32, #tpu.memory_space<vmem>>, vector<1x128x32xf32>
    %170 = vector.shape_cast %169 : vector<1x128x32xf32> to vector<128x32xf32>
    %cst_75 = arith.constant dense<0.000000e+00> : vector<8x32xf32>
    %171 = tpu.matmul %168, %170, %cst_75 {dimension_numbers = #tpu.dot_dimension_numbers<[1], [0], [0], [1], [0, 0, 1, 1], [], []>} : vector<8x128xf32>, vector<128x32xf32>, vector<8x32xf32> -> vector<8x32xf32>
    %172 = arith.addf %124, %171 : vector<8x32xf32>
    %c0_76 = arith.constant 0 : index
    %c0_77 = arith.constant 0 : index
    %c0_78 = arith.constant 0 : index
    %173 = vector.load %arg13[%c0_76, %c0_77, %c0_78] : memref<2x1x32xf32, #tpu.memory_space<vmem>>, vector<1x1x32xf32>
    %174 = vector.shape_cast %173 : vector<1x1x32xf32> to vector<1x32xf32>
    %175 = vector.broadcast %174 : vector<1x32xf32> to vector<8x32xf32>
    %176 = arith.addf %172, %175 : vector<8x32xf32>
    %c1 = arith.constant 1 : index
    %c0_79 = arith.constant 0 : index
    %c0_80 = arith.constant 0 : index
    %177 = vector.load %arg2[%c1, %c0_79, %c0_80] : memref<2x1x32xf32, #tpu.memory_space<vmem>>, vector<1x1x32xf32>
    %178 = vector.shape_cast %177 : vector<1x1x32xf32> to vector<1x32xf32>
    %c1_81 = arith.constant 1 : index
    %c0_82 = arith.constant 0 : index
    %c0_83 = arith.constant 0 : index
    %179 = vector.load %arg3[%c1_81, %c0_82, %c0_83] : memref<2x1x32xf32, #tpu.memory_space<vmem>>, vector<1x1x32xf32>
    %180 = vector.shape_cast %179 : vector<1x1x32xf32> to vector<1x32xf32>
    %cst_84 = arith.constant dense<0.000000e+00> : vector<8xf32>
    %181 = vector.multi_reduction <add>, %176, %cst_84 [1] : vector<8x32xf32> to vector<8xf32>
    %182 = vector.shape_cast %181 : vector<8xf32> to vector<8x1xf32>
    %cst_85 = arith.constant 3.200000e+01 : f32
    %183 = vector.broadcast %cst_85 : f32 to vector<8x1xf32>
    %184 = arith.divf %182, %183 : vector<8x1xf32>
    %185 = vector.broadcast %184 : vector<8x1xf32> to vector<8x32xf32>
    %186 = arith.subf %176, %185 : vector<8x32xf32>
    %187 = arith.mulf %186, %186 : vector<8x32xf32>
    %cst_86 = arith.constant dense<0.000000e+00> : vector<8xf32>
    %188 = vector.multi_reduction <add>, %187, %cst_86 [1] : vector<8x32xf32> to vector<8xf32>
    %189 = vector.shape_cast %188 : vector<8xf32> to vector<8x1xf32>
    %cst_87 = arith.constant 3.200000e+01 : f32
    %190 = vector.broadcast %cst_87 : f32 to vector<8x1xf32>
    %191 = arith.divf %189, %190 : vector<8x1xf32>
    %cst_88 = arith.constant 9.99999974E-6 : f32
    %192 = vector.broadcast %cst_88 : f32 to vector<8x1xf32>
    %193 = arith.addf %191, %192 : vector<8x1xf32>
    %194 = math.rsqrt %193 : vector<8x1xf32>
    %195 = vector.broadcast %194 : vector<8x1xf32> to vector<8x32xf32>
    %196 = arith.mulf %186, %195 : vector<8x32xf32>
    %197 = vector.broadcast %178 : vector<1x32xf32> to vector<8x32xf32>
    %198 = arith.mulf %196, %197 : vector<8x32xf32>
    %199 = vector.broadcast %180 : vector<1x32xf32> to vector<8x32xf32>
    %200 = arith.addf %198, %199 : vector<8x32xf32>
    %c1_89 = arith.constant 1 : index
    %c0_90 = arith.constant 0 : index
    %c0_91 = arith.constant 0 : index
    %201 = vector.load %arg4[%c1_89, %c0_90, %c0_91] : memref<2x32x96xf32, #tpu.memory_space<vmem>>, vector<1x32x96xf32>
    %202 = vector.shape_cast %201 : vector<1x32x96xf32> to vector<32x96xf32>
    %cst_92 = arith.constant dense<0.000000e+00> : vector<8x96xf32>
    %203 = tpu.matmul %200, %202, %cst_92 {dimension_numbers = #tpu.dot_dimension_numbers<[1], [0], [0], [1], [0, 0, 1, 1], [], []>} : vector<8x32xf32>, vector<32x96xf32>, vector<8x96xf32> -> vector<8x96xf32>
    %c1_93 = arith.constant 1 : index
    %c0_94 = arith.constant 0 : index
    %c0_95 = arith.constant 0 : index
    %204 = vector.load %arg5[%c1_93, %c0_94, %c0_95] : memref<2x1x96xf32, #tpu.memory_space<vmem>>, vector<1x1x96xf32>
    %205 = vector.shape_cast %204 : vector<1x1x96xf32> to vector<1x96xf32>
    %206 = vector.broadcast %205 : vector<1x96xf32> to vector<8x96xf32>
    %207 = arith.addf %203, %206 : vector<8x96xf32>
    %208 = vector.extract_strided_slice %207 {offsets = [0, 0], sizes = [8, 8], strides = [1, 1]} : vector<8x96xf32> to vector<8x8xf32>
    %209 = vector.extract_strided_slice %207 {offsets = [0, 32], sizes = [8, 8], strides = [1, 1]} : vector<8x96xf32> to vector<8x8xf32>
    %210 = vector.extract_strided_slice %207 {offsets = [0, 64], sizes = [8, 8], strides = [1, 1]} : vector<8x96xf32> to vector<8x8xf32>
    %211 = tpu.transpose %209, [1, 0] : vector<8x8xf32> -> vector<8x8xf32>
    %cst_96 = arith.constant dense<0.000000e+00> : vector<8x8xf32>
    %212 = tpu.matmul %208, %211, %cst_96 {dimension_numbers = #tpu.dot_dimension_numbers<[1], [0], [0], [1], [0, 0, 1, 1], [], []>} : vector<8x8xf32>, vector<8x8xf32>, vector<8x8xf32> -> vector<8x8xf32>
    %cst_97 = arith.constant 0.353553385 : f32
    %213 = vector.broadcast %cst_97 : f32 to vector<8x8xf32>
    %214 = arith.mulf %212, %213 : vector<8x8xf32>
    %cst_98 = arith.constant -1.000000e+30 : f32
    %215 = vector.broadcast %cst_98 : f32 to vector<8x8xf32>
    %216 = arith.select %4, %214, %215 : vector<8x8xi1>, vector<8x8xf32>
    %cst_99 = arith.constant dense<0xFF800000> : vector<8xf32>
    %217 = vector.multi_reduction <maximumf>, %216, %cst_99 [1] : vector<8x8xf32> to vector<8xf32>
    %218 = vector.shape_cast %217 : vector<8xf32> to vector<8x1xf32>
    %219 = vector.broadcast %218 : vector<8x1xf32> to vector<8x8xf32>
    %220 = arith.subf %216, %219 : vector<8x8xf32>
    %221 = math.exp %220 : vector<8x8xf32>
    %cst_100 = arith.constant dense<0.000000e+00> : vector<8xf32>
    %222 = vector.multi_reduction <add>, %221, %cst_100 [1] : vector<8x8xf32> to vector<8xf32>
    %223 = vector.shape_cast %222 : vector<8xf32> to vector<8x1xf32>
    %224 = tpu.reciprocal %223 {approx = true} : vector<8x1xf32> -> vector<8x1xf32>
    %225 = vector.broadcast %224 : vector<8x1xf32> to vector<8x8xf32>
    %226 = arith.mulf %221, %225 : vector<8x8xf32>
    %cst_101 = arith.constant dense<0.000000e+00> : vector<8x8xf32>
    %227 = tpu.matmul %226, %210, %cst_101 {dimension_numbers = #tpu.dot_dimension_numbers<[1], [0], [0], [1], [0, 0, 1, 1], [], []>} : vector<8x8xf32>, vector<8x8xf32>, vector<8x8xf32> -> vector<8x8xf32>
    %228 = vector.extract_strided_slice %207 {offsets = [0, 8], sizes = [8, 8], strides = [1, 1]} : vector<8x96xf32> to vector<8x8xf32>
    %229 = vector.extract_strided_slice %207 {offsets = [0, 40], sizes = [8, 8], strides = [1, 1]} : vector<8x96xf32> to vector<8x8xf32>
    %230 = vector.extract_strided_slice %207 {offsets = [0, 72], sizes = [8, 8], strides = [1, 1]} : vector<8x96xf32> to vector<8x8xf32>
    %231 = tpu.transpose %229, [1, 0] : vector<8x8xf32> -> vector<8x8xf32>
    %cst_102 = arith.constant dense<0.000000e+00> : vector<8x8xf32>
    %232 = tpu.matmul %228, %231, %cst_102 {dimension_numbers = #tpu.dot_dimension_numbers<[1], [0], [0], [1], [0, 0, 1, 1], [], []>} : vector<8x8xf32>, vector<8x8xf32>, vector<8x8xf32> -> vector<8x8xf32>
    %cst_103 = arith.constant 0.353553385 : f32
    %233 = vector.broadcast %cst_103 : f32 to vector<8x8xf32>
    %234 = arith.mulf %232, %233 : vector<8x8xf32>
    %cst_104 = arith.constant -1.000000e+30 : f32
    %235 = vector.broadcast %cst_104 : f32 to vector<8x8xf32>
    %236 = arith.select %4, %234, %235 : vector<8x8xi1>, vector<8x8xf32>
    %cst_105 = arith.constant dense<0xFF800000> : vector<8xf32>
    %237 = vector.multi_reduction <maximumf>, %236, %cst_105 [1] : vector<8x8xf32> to vector<8xf32>
    %238 = vector.shape_cast %237 : vector<8xf32> to vector<8x1xf32>
    %239 = vector.broadcast %238 : vector<8x1xf32> to vector<8x8xf32>
    %240 = arith.subf %236, %239 : vector<8x8xf32>
    %241 = math.exp %240 : vector<8x8xf32>
    %cst_106 = arith.constant dense<0.000000e+00> : vector<8xf32>
    %242 = vector.multi_reduction <add>, %241, %cst_106 [1] : vector<8x8xf32> to vector<8xf32>
    %243 = vector.shape_cast %242 : vector<8xf32> to vector<8x1xf32>
    %244 = tpu.reciprocal %243 {approx = true} : vector<8x1xf32> -> vector<8x1xf32>
    %245 = vector.broadcast %244 : vector<8x1xf32> to vector<8x8xf32>
    %246 = arith.mulf %241, %245 : vector<8x8xf32>
    %cst_107 = arith.constant dense<0.000000e+00> : vector<8x8xf32>
    %247 = tpu.matmul %246, %230, %cst_107 {dimension_numbers = #tpu.dot_dimension_numbers<[1], [0], [0], [1], [0, 0, 1, 1], [], []>} : vector<8x8xf32>, vector<8x8xf32>, vector<8x8xf32> -> vector<8x8xf32>
    %248 = vector.extract_strided_slice %207 {offsets = [0, 16], sizes = [8, 8], strides = [1, 1]} : vector<8x96xf32> to vector<8x8xf32>
    %249 = vector.extract_strided_slice %207 {offsets = [0, 48], sizes = [8, 8], strides = [1, 1]} : vector<8x96xf32> to vector<8x8xf32>
    %250 = vector.extract_strided_slice %207 {offsets = [0, 80], sizes = [8, 8], strides = [1, 1]} : vector<8x96xf32> to vector<8x8xf32>
    %251 = tpu.transpose %249, [1, 0] : vector<8x8xf32> -> vector<8x8xf32>
    %cst_108 = arith.constant dense<0.000000e+00> : vector<8x8xf32>
    %252 = tpu.matmul %248, %251, %cst_108 {dimension_numbers = #tpu.dot_dimension_numbers<[1], [0], [0], [1], [0, 0, 1, 1], [], []>} : vector<8x8xf32>, vector<8x8xf32>, vector<8x8xf32> -> vector<8x8xf32>
    %cst_109 = arith.constant 0.353553385 : f32
    %253 = vector.broadcast %cst_109 : f32 to vector<8x8xf32>
    %254 = arith.mulf %252, %253 : vector<8x8xf32>
    %cst_110 = arith.constant -1.000000e+30 : f32
    %255 = vector.broadcast %cst_110 : f32 to vector<8x8xf32>
    %256 = arith.select %4, %254, %255 : vector<8x8xi1>, vector<8x8xf32>
    %cst_111 = arith.constant dense<0xFF800000> : vector<8xf32>
    %257 = vector.multi_reduction <maximumf>, %256, %cst_111 [1] : vector<8x8xf32> to vector<8xf32>
    %258 = vector.shape_cast %257 : vector<8xf32> to vector<8x1xf32>
    %259 = vector.broadcast %258 : vector<8x1xf32> to vector<8x8xf32>
    %260 = arith.subf %256, %259 : vector<8x8xf32>
    %261 = math.exp %260 : vector<8x8xf32>
    %cst_112 = arith.constant dense<0.000000e+00> : vector<8xf32>
    %262 = vector.multi_reduction <add>, %261, %cst_112 [1] : vector<8x8xf32> to vector<8xf32>
    %263 = vector.shape_cast %262 : vector<8xf32> to vector<8x1xf32>
    %264 = tpu.reciprocal %263 {approx = true} : vector<8x1xf32> -> vector<8x1xf32>
    %265 = vector.broadcast %264 : vector<8x1xf32> to vector<8x8xf32>
    %266 = arith.mulf %261, %265 : vector<8x8xf32>
    %cst_113 = arith.constant dense<0.000000e+00> : vector<8x8xf32>
    %267 = tpu.matmul %266, %250, %cst_113 {dimension_numbers = #tpu.dot_dimension_numbers<[1], [0], [0], [1], [0, 0, 1, 1], [], []>} : vector<8x8xf32>, vector<8x8xf32>, vector<8x8xf32> -> vector<8x8xf32>
    %268 = vector.extract_strided_slice %207 {offsets = [0, 24], sizes = [8, 8], strides = [1, 1]} : vector<8x96xf32> to vector<8x8xf32>
    %269 = vector.extract_strided_slice %207 {offsets = [0, 56], sizes = [8, 8], strides = [1, 1]} : vector<8x96xf32> to vector<8x8xf32>
    %270 = vector.extract_strided_slice %207 {offsets = [0, 88], sizes = [8, 8], strides = [1, 1]} : vector<8x96xf32> to vector<8x8xf32>
    %271 = tpu.transpose %269, [1, 0] : vector<8x8xf32> -> vector<8x8xf32>
    %cst_114 = arith.constant dense<0.000000e+00> : vector<8x8xf32>
    %272 = tpu.matmul %268, %271, %cst_114 {dimension_numbers = #tpu.dot_dimension_numbers<[1], [0], [0], [1], [0, 0, 1, 1], [], []>} : vector<8x8xf32>, vector<8x8xf32>, vector<8x8xf32> -> vector<8x8xf32>
    %cst_115 = arith.constant 0.353553385 : f32
    %273 = vector.broadcast %cst_115 : f32 to vector<8x8xf32>
    %274 = arith.mulf %272, %273 : vector<8x8xf32>
    %cst_116 = arith.constant -1.000000e+30 : f32
    %275 = vector.broadcast %cst_116 : f32 to vector<8x8xf32>
    %276 = arith.select %4, %274, %275 : vector<8x8xi1>, vector<8x8xf32>
    %cst_117 = arith.constant dense<0xFF800000> : vector<8xf32>
    %277 = vector.multi_reduction <maximumf>, %276, %cst_117 [1] : vector<8x8xf32> to vector<8xf32>
    %278 = vector.shape_cast %277 : vector<8xf32> to vector<8x1xf32>
    %279 = vector.broadcast %278 : vector<8x1xf32> to vector<8x8xf32>
    %280 = arith.subf %276, %279 : vector<8x8xf32>
    %281 = math.exp %280 : vector<8x8xf32>
    %cst_118 = arith.constant dense<0.000000e+00> : vector<8xf32>
    %282 = vector.multi_reduction <add>, %281, %cst_118 [1] : vector<8x8xf32> to vector<8xf32>
    %283 = vector.shape_cast %282 : vector<8xf32> to vector<8x1xf32>
    %284 = tpu.reciprocal %283 {approx = true} : vector<8x1xf32> -> vector<8x1xf32>
    %285 = vector.broadcast %284 : vector<8x1xf32> to vector<8x8xf32>
    %286 = arith.mulf %281, %285 : vector<8x8xf32>
    %cst_119 = arith.constant dense<0.000000e+00> : vector<8x8xf32>
    %287 = tpu.matmul %286, %270, %cst_119 {dimension_numbers = #tpu.dot_dimension_numbers<[1], [0], [0], [1], [0, 0, 1, 1], [], []>} : vector<8x8xf32>, vector<8x8xf32>, vector<8x8xf32> -> vector<8x8xf32>
    %288 = tpu.concatenate %227, %247, %267, %287 in 1 : vector<8x8xf32>, vector<8x8xf32>, vector<8x8xf32>, vector<8x8xf32> -> vector<8x32xf32>
    %c1_120 = arith.constant 1 : index
    %c0_121 = arith.constant 0 : index
    %c0_122 = arith.constant 0 : index
    %289 = vector.load %arg6[%c1_120, %c0_121, %c0_122] : memref<2x32x32xf32, #tpu.memory_space<vmem>>, vector<1x32x32xf32>
    %290 = vector.shape_cast %289 : vector<1x32x32xf32> to vector<32x32xf32>
    %cst_123 = arith.constant dense<0.000000e+00> : vector<8x32xf32>
    %291 = tpu.matmul %288, %290, %cst_123 {dimension_numbers = #tpu.dot_dimension_numbers<[1], [0], [0], [1], [0, 0, 1, 1], [], []>} : vector<8x32xf32>, vector<32x32xf32>, vector<8x32xf32> -> vector<8x32xf32>
    %292 = arith.addf %176, %291 : vector<8x32xf32>
    %c1_124 = arith.constant 1 : index
    %c0_125 = arith.constant 0 : index
    %c0_126 = arith.constant 0 : index
    %293 = vector.load %arg7[%c1_124, %c0_125, %c0_126] : memref<2x1x32xf32, #tpu.memory_space<vmem>>, vector<1x1x32xf32>
    %294 = vector.shape_cast %293 : vector<1x1x32xf32> to vector<1x32xf32>
    %295 = vector.broadcast %294 : vector<1x32xf32> to vector<8x32xf32>
    %296 = arith.addf %292, %295 : vector<8x32xf32>
    %c1_127 = arith.constant 1 : index
    %c0_128 = arith.constant 0 : index
    %c0_129 = arith.constant 0 : index
    %297 = vector.load %arg8[%c1_127, %c0_128, %c0_129] : memref<2x1x32xf32, #tpu.memory_space<vmem>>, vector<1x1x32xf32>
    %298 = vector.shape_cast %297 : vector<1x1x32xf32> to vector<1x32xf32>
    %c1_130 = arith.constant 1 : index
    %c0_131 = arith.constant 0 : index
    %c0_132 = arith.constant 0 : index
    %299 = vector.load %arg9[%c1_130, %c0_131, %c0_132] : memref<2x1x32xf32, #tpu.memory_space<vmem>>, vector<1x1x32xf32>
    %300 = vector.shape_cast %299 : vector<1x1x32xf32> to vector<1x32xf32>
    %cst_133 = arith.constant dense<0.000000e+00> : vector<8xf32>
    %301 = vector.multi_reduction <add>, %296, %cst_133 [1] : vector<8x32xf32> to vector<8xf32>
    %302 = vector.shape_cast %301 : vector<8xf32> to vector<8x1xf32>
    %cst_134 = arith.constant 3.200000e+01 : f32
    %303 = vector.broadcast %cst_134 : f32 to vector<8x1xf32>
    %304 = arith.divf %302, %303 : vector<8x1xf32>
    %305 = vector.broadcast %304 : vector<8x1xf32> to vector<8x32xf32>
    %306 = arith.subf %296, %305 : vector<8x32xf32>
    %307 = arith.mulf %306, %306 : vector<8x32xf32>
    %cst_135 = arith.constant dense<0.000000e+00> : vector<8xf32>
    %308 = vector.multi_reduction <add>, %307, %cst_135 [1] : vector<8x32xf32> to vector<8xf32>
    %309 = vector.shape_cast %308 : vector<8xf32> to vector<8x1xf32>
    %cst_136 = arith.constant 3.200000e+01 : f32
    %310 = vector.broadcast %cst_136 : f32 to vector<8x1xf32>
    %311 = arith.divf %309, %310 : vector<8x1xf32>
    %cst_137 = arith.constant 9.99999974E-6 : f32
    %312 = vector.broadcast %cst_137 : f32 to vector<8x1xf32>
    %313 = arith.addf %311, %312 : vector<8x1xf32>
    %314 = math.rsqrt %313 : vector<8x1xf32>
    %315 = vector.broadcast %314 : vector<8x1xf32> to vector<8x32xf32>
    %316 = arith.mulf %306, %315 : vector<8x32xf32>
    %317 = vector.broadcast %298 : vector<1x32xf32> to vector<8x32xf32>
    %318 = arith.mulf %316, %317 : vector<8x32xf32>
    %319 = vector.broadcast %300 : vector<1x32xf32> to vector<8x32xf32>
    %320 = arith.addf %318, %319 : vector<8x32xf32>
    %c1_138 = arith.constant 1 : index
    %c0_139 = arith.constant 0 : index
    %c0_140 = arith.constant 0 : index
    %321 = vector.load %arg10[%c1_138, %c0_139, %c0_140] : memref<2x32x128xf32, #tpu.memory_space<vmem>>, vector<1x32x128xf32>
    %322 = vector.shape_cast %321 : vector<1x32x128xf32> to vector<32x128xf32>
    %cst_141 = arith.constant dense<0.000000e+00> : vector<8x128xf32>
    %323 = tpu.matmul %320, %322, %cst_141 {dimension_numbers = #tpu.dot_dimension_numbers<[1], [0], [0], [1], [0, 0, 1, 1], [], []>} : vector<8x32xf32>, vector<32x128xf32>, vector<8x128xf32> -> vector<8x128xf32>
    %c1_142 = arith.constant 1 : index
    %c0_143 = arith.constant 0 : index
    %c0_144 = arith.constant 0 : index
    %324 = vector.load %arg11[%c1_142, %c0_143, %c0_144] : memref<2x1x128xf32, #tpu.memory_space<vmem>>, vector<1x1x128xf32>
    %325 = vector.shape_cast %324 : vector<1x1x128xf32> to vector<1x128xf32>
    %326 = vector.broadcast %325 : vector<1x128xf32> to vector<8x128xf32>
    %327 = arith.addf %323, %326 : vector<8x128xf32>
    %328 = arith.mulf %327, %327 : vector<8x128xf32>
    %329 = arith.mulf %327, %328 : vector<8x128xf32>
    %cst_145 = arith.constant 4.471500e-02 : f32
    %330 = vector.broadcast %cst_145 : f32 to vector<8x128xf32>
    %331 = arith.mulf %330, %329 : vector<8x128xf32>
    %332 = arith.addf %327, %331 : vector<8x128xf32>
    %cst_146 = arith.constant 0.797884583 : f32
    %333 = vector.broadcast %cst_146 : f32 to vector<8x128xf32>
    %334 = arith.mulf %333, %332 : vector<8x128xf32>
    %335 = math.tanh %334 : vector<8x128xf32>
    %cst_147 = arith.constant 1.000000e+00 : f32
    %336 = vector.broadcast %cst_147 : f32 to vector<8x128xf32>
    %337 = arith.addf %336, %335 : vector<8x128xf32>
    %cst_148 = arith.constant 5.000000e-01 : f32
    %338 = vector.broadcast %cst_148 : f32 to vector<8x128xf32>
    %339 = arith.mulf %338, %337 : vector<8x128xf32>
    %340 = arith.mulf %327, %339 : vector<8x128xf32>
    %c1_149 = arith.constant 1 : index
    %c0_150 = arith.constant 0 : index
    %c0_151 = arith.constant 0 : index
    %341 = vector.load %arg12[%c1_149, %c0_150, %c0_151] : memref<2x128x32xf32, #tpu.memory_space<vmem>>, vector<1x128x32xf32>
    %342 = vector.shape_cast %341 : vector<1x128x32xf32> to vector<128x32xf32>
    %cst_152 = arith.constant dense<0.000000e+00> : vector<8x32xf32>
    %343 = tpu.matmul %340, %342, %cst_152 {dimension_numbers = #tpu.dot_dimension_numbers<[1], [0], [0], [1], [0, 0, 1, 1], [], []>} : vector<8x128xf32>, vector<128x32xf32>, vector<8x32xf32> -> vector<8x32xf32>
    %344 = arith.addf %296, %343 : vector<8x32xf32>
    %c1_153 = arith.constant 1 : index
    %c0_154 = arith.constant 0 : index
    %c0_155 = arith.constant 0 : index
    %345 = vector.load %arg13[%c1_153, %c0_154, %c0_155] : memref<2x1x32xf32, #tpu.memory_space<vmem>>, vector<1x1x32xf32>
    %346 = vector.shape_cast %345 : vector<1x1x32xf32> to vector<1x32xf32>
    %347 = vector.broadcast %346 : vector<1x32xf32> to vector<8x32xf32>
    %348 = arith.addf %344, %347 : vector<8x32xf32>
    %c0_156 = arith.constant 0 : index
    %c0_157 = arith.constant 0 : index
    %349 = vector.load %arg14[%c0_156, %c0_157] : memref<1x32xf32, #tpu.memory_space<vmem>>, vector<1x32xf32>
    %c0_158 = arith.constant 0 : index
    %c0_159 = arith.constant 0 : index
    %350 = vector.load %arg15[%c0_158, %c0_159] : memref<1x32xf32, #tpu.memory_space<vmem>>, vector<1x32xf32>
    %cst_160 = arith.constant dense<0.000000e+00> : vector<8xf32>
    %351 = vector.multi_reduction <add>, %348, %cst_160 [1] : vector<8x32xf32> to vector<8xf32>
    %352 = vector.shape_cast %351 : vector<8xf32> to vector<8x1xf32>
    %cst_161 = arith.constant 3.200000e+01 : f32
    %353 = vector.broadcast %cst_161 : f32 to vector<8x1xf32>
    %354 = arith.divf %352, %353 : vector<8x1xf32>
    %355 = vector.broadcast %354 : vector<8x1xf32> to vector<8x32xf32>
    %356 = arith.subf %348, %355 : vector<8x32xf32>
    %357 = arith.mulf %356, %356 : vector<8x32xf32>
    %cst_162 = arith.constant dense<0.000000e+00> : vector<8xf32>
    %358 = vector.multi_reduction <add>, %357, %cst_162 [1] : vector<8x32xf32> to vector<8xf32>
    %359 = vector.shape_cast %358 : vector<8xf32> to vector<8x1xf32>
    %cst_163 = arith.constant 3.200000e+01 : f32
    %360 = vector.broadcast %cst_163 : f32 to vector<8x1xf32>
    %361 = arith.divf %359, %360 : vector<8x1xf32>
    %cst_164 = arith.constant 9.99999974E-6 : f32
    %362 = vector.broadcast %cst_164 : f32 to vector<8x1xf32>
    %363 = arith.addf %361, %362 : vector<8x1xf32>
    %364 = math.rsqrt %363 : vector<8x1xf32>
    %365 = vector.broadcast %364 : vector<8x1xf32> to vector<8x32xf32>
    %366 = arith.mulf %356, %365 : vector<8x32xf32>
    %367 = vector.broadcast %349 : vector<1x32xf32> to vector<8x32xf32>
    %368 = arith.mulf %366, %367 : vector<8x32xf32>
    %369 = vector.broadcast %350 : vector<1x32xf32> to vector<8x32xf32>
    %370 = arith.addf %368, %369 : vector<8x32xf32>
    %c0_165 = arith.constant 0 : index
    %c0_166 = arith.constant 0 : index
    %371 = vector.load %arg16[%c0_165, %c0_166] : memref<32x128xf32, #tpu.memory_space<vmem>>, vector<32x128xf32>
    %cst_167 = arith.constant dense<0.000000e+00> : vector<8x128xf32>
    %372 = tpu.matmul %370, %371, %cst_167 {dimension_numbers = #tpu.dot_dimension_numbers<[1], [0], [0], [1], [0, 0, 1, 1], [], []>} : vector<8x32xf32>, vector<32x128xf32>, vector<8x128xf32> -> vector<8x128xf32>
    %c0_168 = arith.constant 0 : index
    %c0_169 = arith.constant 0 : index
    %373 = vector.load %arg17[%c0_168, %c0_169] : memref<1x128xf32, #tpu.memory_space<vmem>>, vector<1x128xf32>
    %374 = vector.broadcast %373 : vector<1x128xf32> to vector<8x128xf32>
    %375 = arith.addf %372, %374 : vector<8x128xf32>
    %c0_170 = arith.constant 0 : index
    %c0_171 = arith.constant 0 : index
    %c0_172 = arith.constant 0 : index
    %376 = vector.load %arg18[%c0_170, %c0_171, %c0_172] : memref<1x8x128xf32, #tpu.memory_space<vmem>>, vector<1x8x128xf32>
    %377 = vector.shape_cast %376 : vector<1x8x128xf32> to vector<8x128xf32>
    %378 = vector.shape_cast %375 : vector<8x128xf32> to vector<1x8x128xf32>
    tpu.vector_store %arg18[%c0_170, %c0_171, %c0_172], %378 {strides = array<i32>} : memref<1x8x128xf32, #tpu.memory_space<vmem>>, vector<1x8x128xf32>,
    return
  }
  func.func @transform_0(%arg0: i32) -> (i32, i32, i32) {
    %c0_i32 = arith.constant 0 : i32
    %c0_i32_0 = arith.constant 0 : i32
    %c0_i32_1 = arith.constant 0 : i32
    return %arg0, %c0_i32, %c0_i32_0 : i32, i32, i32
  }
  func.func @transform_1(%arg0: i32) -> (i32, i32, i32) {
    %c0_i32 = arith.constant 0 : i32
    %c0_i32_0 = arith.constant 0 : i32
    %c0_i32_1 = arith.constant 0 : i32
    %c0_i32_2 = arith.constant 0 : i32
    return %c0_i32, %c0_i32_0, %c0_i32_1 : i32, i32, i32
  }
  func.func @transform_2(%arg0: i32) -> (i32, i32, i32) {
    %c0_i32 = arith.constant 0 : i32
    %c0_i32_0 = arith.constant 0 : i32
    %c0_i32_1 = arith.constant 0 : i32
    %c0_i32_2 = arith.constant 0 : i32
    return %c0_i32, %c0_i32_0, %c0_i32_1 : i32, i32, i32
  }
  func.func @transform_3(%arg0: i32) -> (i32, i32, i32) {
    %c0_i32 = arith.constant 0 : i32
    %c0_i32_0 = arith.constant 0 : i32
    %c0_i32_1 = arith.constant 0 : i32
    %c0_i32_2 = arith.constant 0 : i32
    return %c0_i32, %c0_i32_0, %c0_i32_1 : i32, i32, i32
  }
  func.func @transform_4(%arg0: i32) -> (i32, i32, i32) {
    %c0_i32 = arith.constant 0 : i32
    %c0_i32_0 = arith.constant 0 : i32
    %c0_i32_1 = arith.constant 0 : i32
    %c0_i32_2 = arith.constant 0 : i32
    return %c0_i32, %c0_i32_0, %c0_i32_1 : i32, i32, i32
  }
  func.func @transform_5(%arg0: i32) -> (i32, i32, i32) {
    %c0_i32 = arith.constant 0 : i32
    %c0_i32_0 = arith.constant 0 : i32
    %c0_i32_1 = arith.constant 0 : i32
    %c0_i32_2 = arith.constant 0 : i32
    return %c0_i32, %c0_i32_0, %c0_i32_1 : i32, i32, i32
  }
  func.func @transform_6(%arg0: i32) -> (i32, i32, i32) {
    %c0_i32 = arith.constant 0 : i32
    %c0_i32_0 = arith.constant 0 : i32
    %c0_i32_1 = arith.constant 0 : i32
    %c0_i32_2 = arith.constant 0 : i32
    return %c0_i32, %c0_i32_0, %c0_i32_1 : i32, i32, i32
  }
  func.func @transform_7(%arg0: i32) -> (i32, i32, i32) {
    %c0_i32 = arith.constant 0 : i32
    %c0_i32_0 = arith.constant 0 : i32
    %c0_i32_1 = arith.constant 0 : i32
    %c0_i32_2 = arith.constant 0 : i32
    return %c0_i32, %c0_i32_0, %c0_i32_1 : i32, i32, i32
  }
  func.func @transform_8(%arg0: i32) -> (i32, i32, i32) {
    %c0_i32 = arith.constant 0 : i32
    %c0_i32_0 = arith.constant 0 : i32
    %c0_i32_1 = arith.constant 0 : i32
    %c0_i32_2 = arith.constant 0 : i32
    return %c0_i32, %c0_i32_0, %c0_i32_1 : i32, i32, i32
  }
  func.func @transform_9(%arg0: i32) -> (i32, i32, i32) {
    %c0_i32 = arith.constant 0 : i32
    %c0_i32_0 = arith.constant 0 : i32
    %c0_i32_1 = arith.constant 0 : i32
    %c0_i32_2 = arith.constant 0 : i32
    return %c0_i32, %c0_i32_0, %c0_i32_1 : i32, i32, i32
  }
  func.func @transform_10(%arg0: i32) -> (i32, i32, i32) {
    %c0_i32 = arith.constant 0 : i32
    %c0_i32_0 = arith.constant 0 : i32
    %c0_i32_1 = arith.constant 0 : i32
    %c0_i32_2 = arith.constant 0 : i32
    return %c0_i32, %c0_i32_0, %c0_i32_1 : i32, i32, i32
  }
  func.func @transform_11(%arg0: i32) -> (i32, i32, i32) {
    %c0_i32 = arith.constant 0 : i32
    %c0_i32_0 = arith.constant 0 : i32
    %c0_i32_1 = arith.constant 0 : i32
    %c0_i32_2 = arith.constant 0 : i32
    return %c0_i32, %c0_i32_0, %c0_i32_1 : i32, i32, i32
  }
  func.func @transform_12(%arg0: i32) -> (i32, i32, i32) {
    %c0_i32 = arith.constant 0 : i32
    %c0_i32_0 = arith.constant 0 : i32
    %c0_i32_1 = arith.constant 0 : i32
    %c0_i32_2 = arith.constant 0 : i32
    return %c0_i32, %c0_i32_0, %c0_i32_1 : i32, i32, i32
  }
  func.func @transform_13(%arg0: i32) -> (i32, i32) {
    %c0_i32 = arith.constant 0 : i32
    %c0_i32_0 = arith.constant 0 : i32
    %c0_i32_1 = arith.constant 0 : i32
    return %c0_i32, %c0_i32_0 : i32, i32
  }
  func.func @transform_14(%arg0: i32) -> (i32, i32) {
    %c0_i32 = arith.constant 0 : i32
    %c0_i32_0 = arith.constant 0 : i32
    %c0_i32_1 = arith.constant 0 : i32
    return %c0_i32, %c0_i32_0 : i32, i32
  }
  func.func @transform_15(%arg0: i32) -> (i32, i32) {
    %c0_i32 = arith.constant 0 : i32
    %c0_i32_0 = arith.constant 0 : i32
    %c0_i32_1 = arith.constant 0 : i32
    return %c0_i32, %c0_i32_0 : i32, i32
  }
  func.func @transform_16(%arg0: i32) -> (i32, i32) {
    %c0_i32 = arith.constant 0 : i32
    %c0_i32_0 = arith.constant 0 : i32
    %c0_i32_1 = arith.constant 0 : i32
    return %c0_i32, %c0_i32_0 : i32, i32
  }
  func.func @transform_17(%arg0: i32) -> (i32, i32, i32) {
    %c0_i32 = arith.constant 0 : i32
    %c0_i32_0 = arith.constant 0 : i32
    %c0_i32_1 = arith.constant 0 : i32
    return %arg0, %c0_i32, %c0_i32_0 : i32, i32, i32
  }
}

</mosaic_0001>

<bundles_post_ra>
// kernel: forward.1
= control target key start
LH: loop header
LB: loop body
LE: loop exit
PB: predicated region body
PF: predicated region fallthrough
CT: control target
= control target key end

     0   :  { %s1953_s24 = smov 0   ;;  %s2388_s0 = inlined_call_operand.vmem [shape: f32[2,8,32], index: 0, kind: input, shape index: {}]   ;;  %s2389_s1 = inlined_call_operand.vmem [shape: f32[2,1,32], index: 1, kind: input, shape index: {}]   ;;  %s2390_s2 = inlined_call_operand.vmem [shape: f32[2,1,32], index: 2, kind: input, shape index: {}]   ;;  %s2391_s3 = inlined_call_operand.vmem [shape: f32[2,32,96], index: 3, kind: input, shape index: {}]   ;;  %s2392_s4 = inlined_call_operand.vmem [shape: f32[2,1,96], index: 4, kind: input, shape index: {}]   ;;  %s2393_s5 = inlined_call_operand.vmem [shape: f32[2,32,32], index: 5, kind: input, shape index: {}]   ;;  %s2394_s6 = inlined_call_operand.vmem [shape: f32[2,1,32], index: 6, kind: input, shape index: {}]   ;;  %s2395_s7 = inlined_call_operand.vmem [shape: f32[2,1,32], index: 7, kind: input, shape index: {}]   ;;  %s2396_s8 = inlined_call_operand.vmem [shape: f32[2,1,32], index: 8, kind: input, shape index: {}]   ;;  %s2397_s9 = inlined_call_operand.vmem [shape: f32[2,32,128], index: 9, kind: input, shape index: {}]   ;;  %s2398_s10 = inlined_call_operand.vmem [shape: f32[2,1,128], index: 10, kind: input, shape index: {}]   ;;  %s2399_s11 = inlined_call_operand.vmem [shape: f32[2,128,32], index: 11, kind: input, shape index: {}]   ;;  %s2400_s12 = inlined_call_operand.vmem [shape: f32[2,1,32], index: 12, kind: input, shape index: {}]   ;;  %s2401_s13 = inlined_call_operand.vmem [shape: f32[1,32], index: 13, kind: input, shape index: {}]   ;;  %s2402_s14 = inlined_call_operand.vmem [shape: f32[1,32], index: 14, kind: input, shape index: {}]   ;;  %s2403_s15 = inlined_call_operand.vmem [shape: f32[32,128], index: 15, kind: input, shape index: {}]   ;;  %s2404_s16 = inlined_call_operand.vmem [shape: f32[1,128], index: 16, kind: input, shape index: {}]   ;;  %s2405_s17 = inlined_call_operand.vmem [shape: f32[2,8,128], index: 17, kind: output, shape index: {}]  }
   0x1   :  { %2420 = sst [smem:[#allocation2_spill]] %s2388_s0 }
   0x2   :  { %2421 = sst [smem:[#allocation3_spill]] %s2389_s1 }
   0x3 LB: > { %s1674_s25 = sadd.s32 4294967295, %s1846_s24   ;;  %p1678_p0 = scmp.ge.s32.totalorder %s1846_s24, 1  ;;  %s1846_s24 = sphi %s1953_s24, %s27_s24  }
   0x4   : > { %p486_p1 = scmp.lt.s32.totalorder %s1846_s24, 3 }
   0x6   : > { %p487_p2 = pnand %p1678_p0, %p486_p1 }
   0x7   : > { %p536_p3 = scmp.lt.s32.totalorder (!%p487_p2), %s1674_s25, 1  ;;  %s2422_s29 = sld [smem:[#allocation2_spill]] (!%p487_p2) }
   0x8   : > { %490 = sbr.rel (%p487_p2) target bundleno = 4908 (0x132c), region = 88  ;;  %s1849_s1 = smov (!%p487_p2), 88  }
   0x9   : > { %s2414_s20 = smov (!%p487_p2), 64   ;;  %s2419_s21 = smov (!%p487_p2), 96  }
   0xa   : > { %s2415_s22 = smov (!%p487_p2), 80   ;;  %s1853_s23 = smov (!%p487_p2), 120  }
   0xb   : > { %s2411_s27 = smov (!%p487_p2), 112   ;;  %s2413_s28 = smov (!%p487_p2), 72  }
   0xc   : > { %s2412_s30 = smov (!%p487_p2), 104   ;;  %s2408_s18 = smov (!%p487_p2), 40  }
   0xd   : > { %s2440_s25 = smov (!%p536_p3, %s1674_s25), 1  ;;  %vm552_vm0 = vcmask 261120   ;;  %v1848_v2 = vmov 32.0   ;;  %v593_v14 = vld [vmem:[%s2391_s3 + $0x18] sm:$0xff]  ;;  %v592_v15 = vld [vmem:[%s2391_s3 + $0x10] sm:$0xff]  ;;  %v591_v16 = vld [vmem:[%s2391_s3 + $0x8] sm:$0xff]  ;;  %v545_v43 = vlaneseq }
   0xe   : > { %s2407_s26 = sshll.u32 %s2440_s25, 3  ;;  %1792 = vrcp.f32 %v1848_v2  ;;  %613 = vmatpush.msra.mxu0 %v593_v14  ;;  %v590_v17 = vld [vmem:[%s2391_s3] sm:$0xff]  ;;  %vm624_vm5 = vcmask 64512   ;;  %s2417_s19 = smov 56   ;;  %vm902_vm7 = vcmask 130048   ;;  %vm904_vm8 = vcmask 195584  }
   0xf   : > { %s539_s0 = scalar_lea.vmem %s2422_s29, %s2407_s26  ;;  %s2423_s29 = sld [smem:[#allocation3_spill]]  ;;  %v1774_v30 = vld [vmem:[%s2390_s2] ss:$0 sm:$0xff]  ;;  %v546_v44 = vshrl.u32 %v545_v43, 7  ;;  %v548_v45 = vand.u32 127, %v545_v43  ;;  %v907_v43 = vld [vmem:[%s2393_s5 + $0x8] sm:$0xff] }
  0x10   : > { %v1969_v0 = vld [vmem:[%s539_s0] sm:$0xff]  ;;  %614 = vmatpush.msra.mxu0 %v592_v15  ;;  %s2409_s0 = smov 48   ;;  %s2410_s26 = smov 16  }
  0x11   : > { %v553_v1 = vsel %vm552_vm0, %v1969_v0, 0.0  ;;  %v1775_v33 = vld [vmem:[%s2392_s4] ss:$0 sm:$0xff]  ;;  %vm2024_vm6 = vcmp.le.s32.totalorder %v548_v45, %v546_v44 }
  0x12   : > { %554 = vadd.xlane.f32.xlu0 %v553_v1  ;;  %615 = vmatpush.msra.mxu0 %v591_v16  ;;  %v906_v44 = vld [vmem:[%s2393_s5] sm:$0xff] }
  0x14   : > { %v1793_v3 = vpop.eup %1792  ;;  %616 = vmatpush.msra.mxu0 %v590_v17 }
  0x15   : > { %v557_v4 = vmul.f32 32.0, %v1793_v3  ;;  %vm561_vm1 = vweird.f32 %v1793_v3  ;;  %v1773_v27 = vld [vmem:[%s2423_s29] ss:$0 sm:$0xff] }
  0x17   : > { %v558_v5 = vsub.f32 1.0, %v557_v4 }
  0x19   : > { %v559_v6 = vmul.f32 %v1793_v3, %v558_v5 }
  0x1b   : > { %v560_v7 = vadd.f32 %v1793_v3, %v559_v6 }
  0x1d   : > { %v1973_v8 = vsel %vm561_vm1, %v1793_v3, %v560_v7 }
  0x85   : > { %v555_v9 = vpop.xlane.xlu0 %554 }
  0x86   : > { %v563_v10 = vmul.f32 %v1973_v8, %v555_v9 }
  0x88   : > { %v564_v11 = vsub.f32 %v1969_v0, %v563_v10 }
  0x8a   : > { %v565_v12 = vmul.f32 %v564_v11, %v564_v11 }
  0x8c   : > { %v566_v13 = vsel %vm552_vm0, %v565_v12, 0.0 }
  0x8d   : > { %567 = vadd.xlane.f32.xlu0 %v566_v13 }
 0x100   : > { %v568_v18 = vpop.xlane.xlu0 %567 }
 0x101   : > { %v569_v19 = vmul.f32 %v568_v18, %v1973_v8 }
 0x103   : > { %v570_v20 = vadd.f32 1e-05, %v569_v19 }
 0x105   : > { %1794 = vrsqrt.f32 %v570_v20  ;;  %vm577_vm3 = vweird.f32 %v570_v20 }
 0x10b   : > { %v1795_v21 = vpop.eup %1794 }
 0x10c   : > { %v572_v22 = vmul.f32 %v1795_v21, %v570_v20  ;;  %vm578_vm2 = vweird.f32 %v1795_v21 }
 0x10d   : > { %vm579_vm4 = vmor %vm577_vm3, %vm578_vm2 }
 0x10e   : > { %v573_v23 = vmul.f32 %v1795_v21, %v572_v22 }
 0x110   : > { %v574_v24 = vmul.f32 0.5, %v573_v23 }
 0x112   : > { %v575_v25 = vsub.f32 1.5, %v574_v24 }
 0x114   : > { %v576_v26 = vmul.f32 %v1795_v21, %v575_v25 }
 0x116   : > { %v580_v28 = vsel %vm579_vm4, %v1795_v21, %v576_v26 }
 0x117   : > { %v581_v29 = vmul.f32 %v580_v28, %v564_v11 }
 0x119   : > { %v585_v31 = vmul.f32 %v1773_v27, %v581_v29 }
 0x11b   : > { %v589_v32 = vadd.f32 %v1774_v30, %v585_v31 }
 0x11d   : > { %1681 = vmatmul.msk.f32.vlgmr.msra.gmra.mxu0 %vm552_vm0, %v589_v32 }
 0x19a   : > { %v618_v34 = vpop.f32.mrf.mxu0 }
 0x19b   : > { %v2001_v35 = vadd.f32 %v1775_v33, %v618_v34 }
 0x19d   : > { %690 = vrot.lane.b32.xlu0 %v2001_v35, %s1849_s1  ;;  %662 = vrot.lane.b32.xlu2 %v2001_v35, %s2414_s20  ;;  %s2435_s20 = smov 40  }
 0x19e   : > { %622 = vrot.lane.b32.xlu1 %v2001_v35, %s2419_s21  ;;  %s2430_s21 = smov 72  }
 0x1a5   : > { %757 = vrot.lane.b32.xlu0 %v2001_v35, %s2415_s22  ;;  %688 = vrot.lane.b32.xlu2 %v2001_v35, %s1853_s23 }
 0x1ad   : > { %755 = vrot.lane.b32.xlu0 %v2001_v35, %s2411_s27  ;;  %824 = vrot.lane.b32.xlu2 %v2001_v35, %s2413_s28  ;;  %s2426_s28 = smov 96  }
 0x1f7   : > { %v663_v36 = vpop.permute.xlu2 %662 }
 0x1f8   : > { %683 = vmatpush.msra.mxu2 %v663_v36 }
 0x1ff   : > { %v689_v37 = vpop.permute.xlu2 %688 }
 0x207   : > { %v825_v38 = vpop.permute.xlu2 %824 }
 0x208   : > { %1691 = vmatpush.xpose.msk.msrb.mxu0 %vm624_vm5, %v825_v38 }
 0x20f   : > { %v691_v39 = vpop.permute.xlu0 %690 }
 0x210   : > { %v623_v40 = vpop.permute.xlu1 %622  ;;  %1685 = vmatpush.xpose.msk.msrb.mxu2 %vm624_vm5, %v691_v39 }
 0x211   : > { %1682 = vmatpush.xpose.msk.msra.mxu1 %vm624_vm5, %v623_v40 }
 0x214   : > { %1683 = vmatmul.msk.f32.vlgmr.msra.gmra.mxu1 %vm624_vm5, %v2001_v35 }
 0x217   : > { %v758_v41 = vpop.permute.xlu0 %757 }
 0x218   : > { %1688 = vmatpush.xpose.msk.msrb.mxu1 %vm624_vm5, %v758_v41  ;;  %v909_v41 = vld [vmem:[%s2393_s5 + $0x18] sm:$0xff] }
 0x21c   : > { %925 = vmatpush.msra.mxu1 %v909_v41 }
 0x21f   : > { %v756_v42 = vpop.permute.xlu0 %755 }
 0x220   : > { %1689 = vmatmul.msk.f32.vlgmr.msrb.gmra.mxu1 %vm624_vm5, %v756_v42  ;;  %v908_v42 = vld [vmem:[%s2393_s5 + $0x10] sm:$0xff] }
 0x221   : > { %926 = vmatpush.msra.mxu1 %v908_v42 }
 0x223   : > { %927 = vmatpush.msra.mxu1 %v907_v43 }
 0x225   : > { %928 = vmatpush.msra.mxu1 %v906_v44 }
 0x291   : > { %v646_v46 = vpop.f32.mrf.mxu1 }
 0x292   : > { %v649_v48 = vmul.f32 0.35355338, %v646_v46 }
 0x294   : > { %v650_v49 = vsel %vm2024_vm6, %v649_v48, -1e+30 }
 0x295   : > { %v651_v50 = vsel %vm624_vm5, %v650_v49, -inf }
 0x296   : > { %652 = vmax.xlane.f32.xlu1 %v651_v50 }
 0x29d   : > { %v780_v51 = vpop.f32.mrf.mxu1 }
 0x29e   : > { %v783_v52 = vmul.f32 0.35355338, %v780_v51 }
 0x2a0   : > { %v784_v53 = vsel %vm2024_vm6, %v783_v52, -1e+30  ;;  %v1776_v52 = vld [vmem:[%s2394_s6] ss:$0 sm:$0xff] }
 0x2a1   : > { %v785_v54 = vsel %vm624_vm5, %v784_v53, -inf }
 0x2a2   : > { %786 = vmax.xlane.f32.xlu0 %v785_v54 }
 0x2b6   : > { %796 = vrot.lane.b32.xlu0 %v2001_v35, %s2409_s0  ;;  %s2418_s0 = smov 24  }
 0x309   : > { %v653_v55 = vpop.xlane.xlu1 %652 }
 0x30a   : > { %v654_v56 = vsub.f32 %v650_v49, %v653_v55 }
 0x30c   : > { %v655_v57 = vmul.f32 1.442695, %v654_v56 }
 0x30e   : > { %1796 = vpow2.f32 %v655_v57 }
 0x314   : > { %v1797_v58 = vpop.eup %1796 }
 0x315   : > { %v657_v59 = vsel %vm624_vm5, %v1797_v58, 0.0  ;;  %v787_v60 = vpop.xlane.xlu0 %786 }
 0x316   : > { %658 = vadd.xlane.f32.xlu2 %v657_v59  ;;  %v788_v9 = vsub.f32 %v784_v53, %v787_v60 }
 0x318   : > { %v789_v10 = vmul.f32 1.442695, %v788_v9 }
 0x328   : > { %v797_v61 = vpop.permute.xlu0 %796 }
 0x329   : > { %817 = vmatpush.msra.mxu3 %v797_v61 }
 0x32e   : > { %822 = vrot.lane.b32.xlu2 %v2001_v35, %s2412_s30  ;;  %s2427_s30 = smov 56  }
 0x389   : > { %v659_v62 = vpop.xlane.xlu2 %658 }
 0x38a   : > { %1798 = vrcp.f32 %v659_v62  ;;  %v974_v62 = vld [vmem:[%s2397_s9 + $0x18] sm:$0xff] }
 0x38b   : > { %1800 = vpow2.f32 %v789_v10  ;;  %994 = vmatpush.msrb.mxu1 %v974_v62 }
 0x390   : > { %v1799_v63 = vpop.eup %1798 }
 0x391   : > { %v823_v1 = vpop.permute.xlu2 %822  ;;  %v661_v2 = vmul.f32 %v1799_v63, %v1797_v58  ;;  %v1801_v15 = vpop.eup %1800  ;;  %v972_v63 = vld [vmem:[%s2397_s9 + $0x8] sm:$0xff] }
 0x392   : > { %1692 = vmatmul.msk.f32.vlgmr.msrb.gmra.mxu0 %vm624_vm5, %v823_v1  ;;  %v791_v16 = vsel %vm624_vm5, %v1801_v15, 0.0  ;;  %v971_v1 = vld [vmem:[%s2397_s9] sm:$0xff] }
 0x393   : > { %1684 = vmatmul.msk.f32.vlgmr.msra.gmra.mxu2 %vm624_vm5, %v661_v2  ;;  %v1026_v2 = vld [vmem:[%s2399_s11 + $0x78] sm:$0xff] }
 0x394   : > { %1027 = vmatpush.msra.mxu0 %v1026_v2 }
 0x39b   : > { %1686 = vmatmul.msk.f32.vlgmr.msrb.gmra.mxu2 %vm624_vm5, %v689_v37 }
 0x40f   : > { %v847_v3 = vpop.f32.mrf.mxu0 }
 0x410   : > { %v850_v4 = vmul.f32 0.35355338, %v847_v3  ;;  %v1025_v3 = vld [vmem:[%s2399_s11 + $0x70] sm:$0xff] }
 0x411   : > { %1028 = vmatpush.msra.mxu0 %v1025_v3 }
 0x412   : > { %v851_v5 = vsel %vm2024_vm6, %v850_v4, -1e+30  ;;  %v1024_v4 = vld [vmem:[%s2399_s11 + $0x68] sm:$0xff] }
 0x413   : > { %v852_v6 = vsel %vm624_vm5, %v851_v5, -inf  ;;  %1029 = vmatpush.msra.mxu0 %v1024_v4 }
 0x414   : > { %853 = vmax.xlane.f32.xlu2 %v852_v6 }
 0x416   : > { %v2045_v7 = vpop.f32.mrf.mxu2 }
 0x41e   : > { %v713_v11 = vpop.f32.mrf.mxu2 }
 0x41f   : > { %v716_v12 = vmul.f32 0.35355338, %v713_v11 }
 0x421   : > { %v717_v13 = vsel %vm2024_vm6, %v716_v12, -1e+30 }
 0x422   : > { %v718_v14 = vsel %vm624_vm5, %v717_v13, -inf }
 0x423   : > { %719 = vmax.xlane.f32.xlu1 %v718_v14 }
 0x42b   : > { %792 = vadd.xlane.f32.xlu1 %v791_v16 }
 0x42c   : > { %863 = vrot.lane.b32.xlu2 %v2001_v35, %s2408_s18  ;;  %s2416_s18 = smov 8  }
 0x487   : > { %v854_v17 = vpop.xlane.xlu2 %853 }
 0x488   : > { %v855_v18 = vsub.f32 %v851_v5, %v854_v17 }
 0x48a   : > { %v856_v19 = vmul.f32 1.442695, %v855_v18  ;;  %v1778_v18 = vld [vmem:[%s2396_s8] ss:$0 sm:$0xff] }
 0x48c   : > { %1802 = vpow2.f32 %v856_v19 }
 0x48f   : > { %v864_v37 = vpop.permute.xlu2 %863 }
 0x492   : > { %v1803_v20 = vpop.eup %1802 }
 0x493   : > { %v858_v21 = vsel %vm624_vm5, %v1803_v20, 0.0 }
 0x494   : > { %859 = vadd.xlane.f32.xlu1 %v858_v21  ;;  %v1023_v21 = vld [vmem:[%s2399_s11 + $0x60] sm:$0xff] }
 0x495   : > { %1030 = vmatpush.msra.mxu0 %v1023_v21 }
 0x496   : > { %v720_v22 = vpop.xlane.xlu1 %719 }
 0x497   : > { %v721_v23 = vsub.f32 %v717_v13, %v720_v22  ;;  %v1022_v22 = vld [vmem:[%s2399_s11 + $0x58] sm:$0xff] }
 0x498   : > { %1031 = vmatpush.msra.mxu0 %v1022_v22 }
 0x499   : > { %v722_v24 = vmul.f32 1.442695, %v721_v23  ;;  %v1021_v23 = vld [vmem:[%s2399_s11 + $0x50] sm:$0xff] }
 0x49a   : > { %1032 = vmatpush.msra.mxu0 %v1021_v23 }
 0x49b   : > { %1804 = vpow2.f32 %v722_v24  ;;  %v1020_v24 = vld [vmem:[%s2399_s11 + $0x48] sm:$0xff] }
 0x49c   : > { %1033 = vmatpush.msra.mxu0 %v1020_v24 }
 0x49e   : > { %v793_v25 = vpop.xlane.xlu1 %792 }
 0x49f   : > { %1806 = vrcp.f32 %v793_v25  ;;  %v1019_v25 = vld [vmem:[%s2399_s11 + $0x40] sm:$0xff] }
 0x4a0   : > { %1034 = vmatpush.msra.mxu0 %v1019_v25 }
 0x4a1   : > { %v1805_v26 = vpop.eup %1804 }
 0x4a2   : > { %v724_v27 = vsel %vm624_vm5, %v1805_v26, 0.0 }
 0x4a3   : > { %725 = vadd.xlane.f32.xlu1 %v724_v27  ;;  %v1017_v27 = vld [vmem:[%s2399_s11 + $0x30] sm:$0xff] }
 0x4a5   : > { %v1807_v28 = vpop.eup %1806 }
 0x4a6   : > { %v795_v29 = vmul.f32 %v1807_v28, %v1801_v15  ;;  %v1777_v15 = vld [vmem:[%s2395_s7] ss:$0 sm:$0xff]  ;;  %v1016_v28 = vld [vmem:[%s2399_s11 + $0x28] sm:$0xff] }
 0x4a8   : > { %1690 = vmatmul.msk.f32.vlgmr.msra.gmra.mxu3 %vm624_vm5, %v795_v29  ;;  %v1015_v29 = vld [vmem:[%s2399_s11 + $0x20] sm:$0xff] }
 0x4bc   : > { %729 = vrot.lane.b32.xlu1 %v2001_v35, %s2417_s19  ;;  %s2433_s19 = smov 48  }
 0x507   : > { %v860_v30 = vpop.xlane.xlu1 %859 }
 0x516   : > { %v726_v31 = vpop.xlane.xlu1 %725 }
 0x517   : > { %1808 = vrcp.f32 %v726_v31  ;;  %v1013_v31 = vld [vmem:[%s2399_s11 + $0x10] sm:$0xff] }
 0x518   : > { %1810 = vrcp.f32 %v860_v30  ;;  %v1014_v30 = vld [vmem:[%s2399_s11 + $0x18] sm:$0xff] }
 0x51d   : > { %v1809_v32 = vpop.eup %1808 }
 0x51e   : > { %v728_v34 = vmul.f32 %v1809_v32, %v1805_v26  ;;  %v1811_v38 = vpop.eup %1810  ;;  %v1018_v26 = vld [vmem:[%s2399_s11 + $0x38] sm:$0xff]  ;;  %v1012_v32 = vld [vmem:[%s2399_s11 + $0x8] sm:$0xff] }
 0x51f   : > { %v862_v39 = vmul.f32 %v1811_v38, %v1803_v20  ;;  %1035 = vmatpush.msra.mxu0 %v1018_v26 }
 0x521   : > { %1036 = vmatpush.msra.mxu0 %v1017_v27 }
 0x523   : > { %1037 = vmatpush.msra.mxu0 %v1016_v28 }
 0x525   : > { %1038 = vmatpush.msra.mxu0 %v1015_v29 }
 0x527   : > { %1039 = vmatpush.msra.mxu0 %v1014_v30 }
 0x529   : > { %1040 = vmatpush.msra.mxu0 %v1013_v31 }
 0x52b   : > { %v819_v33 = vpop.f32.mrf.mxu3  ;;  %1041 = vmatpush.msra.mxu0 %v1012_v32 }
 0x52c   : > { %894 = vrot.lane.b32.xlu0 %v819_v33, %s2410_s26  ;;  %v1011_v33 = vld [vmem:[%s2399_s11] sm:$0xff]  ;;  %s2434_s26 = smov 8  }
 0x52d   : > { %1042 = vmatpush.msra.mxu0 %v1011_v33 }
 0x52e   : > { %v730_v36 = vpop.permute.xlu1 %729 }
 0x52f   : > { %750 = vmatpush.msra.mxu2 %v730_v36 }
 0x530   : > { %1687 = vmatmul.msk.f32.vlgmr.msra.gmra.mxu2 %vm624_vm5, %v728_v34  ;;  %v1779_v34 = vld [vmem:[%s2398_s10] ss:$0 sm:$0xff] }
 0x531   : > { %884 = vmatpush.msrb.mxu2 %v864_v37 }
 0x538   : > { %1693 = vmatmul.msk.f32.vlgmr.msrb.gmra.mxu2 %vm624_vm5, %v862_v39 }
 0x59e   : > { %v895_v48 = vpop.permute.xlu0 %894 }
 0x5b3   : > { %v752_v35 = vpop.f32.mrf.mxu2 }
 0x5b4   : > { %890 = vrot.lane.b32.xlu1 %v752_v35, %s2416_s18  ;;  %s2432_s18 = smov 112  }
 0x5bb   : > { %v886_v40 = vpop.f32.mrf.mxu2 }
 0x5bc   : > { %898 = vrot.lane.b32.xlu1 %v886_v40, %s2418_s0  ;;  %s2431_s0 = smov 104  }
 0x626   : > { %v891_v45 = vpop.permute.xlu1 %890 }
 0x627   : > { %v901_v46 = vsel %vm624_vm5, %v2045_v7, %v891_v45 }
 0x628   : > { %v903_v49 = vsel %vm902_vm7, %v901_v46, %v895_v48  ;;  %v1780_v46 = vld [vmem:[%s2400_s12] ss:$0 sm:$0xff] }
 0x62e   : > { %v899_v50 = vpop.permute.xlu1 %898 }
 0x62f   : > { %v905_v51 = vsel %vm904_vm8, %v903_v49, %v899_v50 }
 0x630   : > { %1694 = vmatmul.msk.f32.vlgmr.msra.gmra.mxu1 %vm552_vm0, %v905_v51 }
 0x6ad   : > { %v930_v53 = vpop.f32.mrf.mxu1 }
 0x6ae   : > { %v933_v54 = vadd.f32 %v930_v53, %v1969_v0  ;;  %v973_v0 = vld [vmem:[%s2397_s9 + $0x10] sm:$0xff] }
 0x6af   : > { %995 = vmatpush.msrb.mxu1 %v973_v0 }
 0x6b0   : > { %v2084_v55 = vadd.f32 %v1776_v52, %v933_v54 }
 0x6b1   : > { %996 = vmatpush.msrb.mxu1 %v972_v63 }
 0x6b2   : > { %v941_v56 = vsel %vm552_vm0, %v2084_v55, 0.0 }
 0x6b3   : > { %942 = vadd.xlane.f32.xlu2 %v941_v56  ;;  %997 = vmatpush.msrb.mxu1 %v971_v1 }
 0x726   : > { %v943_v57 = vpop.xlane.xlu2 %942 }
 0x727   : > { %v944_v58 = vmul.f32 %v943_v57, %v1973_v8 }
 0x729   : > { %v945_v59 = vsub.f32 %v2084_v55, %v944_v58  ;;  %v1701_v58 = vld [vmem:[%s2391_s3 + $0x38] sm:$0xff] }
 0x72a   : > { %1112 = vmatpush.msra.mxu2 %v1701_v58 }
 0x72b   : > { %v946_v60 = vmul.f32 %v945_v59, %v945_v59 }
 0x72d   : > { %v947_v61 = vsel %vm552_vm0, %v946_v60, 0.0  ;;  %v1698_v60 = vld [vmem:[%s2391_s3 + $0x20] sm:$0xff] }
 0x72e   : > { %948 = vadd.xlane.f32.xlu0 %v947_v61 }
 0x7a1   : > { %v949_v5 = vpop.xlane.xlu0 %948 }
 0x7a2   : > { %v950_v6 = vmul.f32 %v949_v5, %v1973_v8 }
 0x7a4   : > { %v951_v7 = vadd.f32 1e-05, %v950_v6  ;;  %v1781_v6 = vld [vmem:[%s2423_s29 + $0x1] ss:$0 sm:$0xff] }
 0x7a6   : > { %1812 = vrsqrt.f32 %v951_v7  ;;  %vm958_vm10 = vweird.f32 %v951_v7 }
 0x7ac   : > { %v1813_v9 = vpop.eup %1812 }
 0x7ad   : > { %v953_v10 = vmul.f32 %v1813_v9, %v951_v7  ;;  %vm959_vm9 = vweird.f32 %v1813_v9 }
 0x7ae   : > { %vm960_vm11 = vmor %vm958_vm10, %vm959_vm9 }
 0x7af   : > { %v954_v11 = vmul.f32 %v1813_v9, %v953_v10  ;;  %v1782_v10 = vld [vmem:[%s2390_s2 + $0x1] ss:$0 sm:$0xff] }
 0x7b1   : > { %v955_v12 = vmul.f32 0.5, %v954_v11 }
 0x7b3   : > { %v956_v13 = vsub.f32 1.5, %v955_v12 }
 0x7b5   : > { %v957_v14 = vmul.f32 %v1813_v9, %v956_v13  ;;  %v1783_v13 = vld [vmem:[%s2392_s4 + $0x1] ss:$0 sm:$0xff] }
 0x7b7   : > { %v961_v16 = vsel %vm960_vm11, %v1813_v9, %v957_v14 }
 0x7b8   : > { %v962_v17 = vmul.f32 %v961_v16, %v945_v59  ;;  %v1699_v59 = vld [vmem:[%s2391_s3 + $0x28] sm:$0xff] }
 0x7ba   : > { %v966_v19 = vmul.f32 %v1777_v15, %v962_v17 }
 0x7bc   : > { %v970_v20 = vadd.f32 %v1778_v18, %v966_v19 }
 0x7be   : > { %1695 = vmatmul.msk.f32.vlgmr.msrb.gmra.mxu1 %vm552_vm0, %v970_v20 }
 0x83b   : > { %v999_v36 = vpop.f32.mrf.mxu1 }
 0x83c   : > { %v1000_v37 = vadd.f32 %v1779_v34, %v999_v36 }
 0x83e   : > { %v1002_v38 = vmul.f32 %v1000_v37, %v1000_v37 }
 0x840   : > { %v1003_v39 = vmul.f32 %v1002_v38, %v1000_v37 }
 0x842   : > { %v1004_v35 = vmul.f32 0.044715, %v1003_v39 }
 0x844   : > { %v1005_v40 = vadd.f32 %v1004_v35, %v1000_v37 }
 0x846   : > { %v1006_v41 = vmul.f32 0.7978846, %v1005_v40 }
 0x848   : > { %1814 = vtanh.f32 %v1006_v41 }
 0x84e   : > { %v1815_v42 = vpop.eup %1814 }
 0x84f   : > { %v1008_v43 = vadd.f32 1.0, %v1815_v42 }
 0x851   : > { %v1009_v44 = vmul.f32 0.5, %v1008_v43 }
 0x853   : > { %v1010_v45 = vmul.f32 %v1009_v44, %v1000_v37 }
 0x855   : > { %1043 = vmatmul.f32.vlgmr.msra.gmra.mxu0 %v1010_v45 }
 0x8d2   : > { %v1044_v48 = vpop.f32.mrf.mxu0 }
 0x8d3   : > { %v1047_v49 = vadd.f32 %v1044_v48, %v2084_v55  ;;  %v1700_v55 = vld [vmem:[%s2391_s3 + $0x30] sm:$0xff] }
 0x8d4   : > { %1113 = vmatpush.msra.mxu2 %v1700_v55 }
 0x8d5   : > { %v2166_v50 = vadd.f32 %v1780_v46, %v1047_v49 }
 0x8d6   : > { %1114 = vmatpush.msra.mxu2 %v1699_v59 }
 0x8d7   : > { %v1057_v51 = vsel %vm552_vm0, %v2166_v50, 0.0 }
 0x8d8   : > { %1058 = vadd.xlane.f32.xlu1 %v1057_v51  ;;  %1115 = vmatpush.msra.mxu2 %v1698_v60 }
 0x94b   : > { %v1059_v52 = vpop.xlane.xlu1 %1058 }
 0x94c   : > { %v1060_v53 = vmul.f32 %v1059_v52, %v1973_v8 }
 0x94e   : > { %v1061_v54 = vsub.f32 %v2166_v50, %v1060_v53 }
 0x950   : > { %v1062_v56 = vmul.f32 %v1061_v54, %v1061_v54 }
 0x952   : > { %v1063_v57 = vsel %vm552_vm0, %v1062_v56, 0.0 }
 0x953   : > { %1064 = vadd.xlane.f32.xlu2 %v1063_v57 }
 0x9c6   : > { %v1065_v61 = vpop.xlane.xlu2 %1064 }
 0x9c7   : > { %v1066_v62 = vmul.f32 %v1065_v61, %v1973_v8 }
 0x9c9   : > { %v1067_v0 = vadd.f32 1e-05, %v1066_v62 }
 0x9cb   : > { %1816 = vrsqrt.f32 %v1067_v0  ;;  %vm1074_vm13 = vweird.f32 %v1067_v0 }
 0x9d1   : > { %v1817_v63 = vpop.eup %1816 }
 0x9d2   : > { %v1069_v1 = vmul.f32 %v1817_v63, %v1067_v0  ;;  %vm1075_vm12 = vweird.f32 %v1817_v63 }
 0x9d3   : > { %vm1076_vm14 = vmor %vm1074_vm13, %vm1075_vm12 }
 0x9d4   : > { %v1070_v2 = vmul.f32 %v1817_v63, %v1069_v1 }
 0x9d6   : > { %v1071_v3 = vmul.f32 0.5, %v1070_v2 }
 0x9d8   : > { %v1072_v4 = vsub.f32 1.5, %v1071_v3 }
 0x9da   : > { %v1073_v5 = vmul.f32 %v1817_v63, %v1072_v4 }
 0x9dc   : > { %v1077_v7 = vsel %vm1076_vm14, %v1817_v63, %v1073_v5 }
 0x9dd   : > { %v1078_v9 = vmul.f32 %v1077_v7, %v1061_v54 }
 0x9df   : > { %v1082_v11 = vmul.f32 %v1781_v6, %v1078_v9 }
 0x9e1   : > { %v1086_v12 = vadd.f32 %v1782_v10, %v1082_v11 }
 0x9e3   : > { %1703 = vmatmul.msk.f32.vlgmr.msra.gmra.mxu2 %vm552_vm0, %v1086_v12 }
 0xa66   : > { %v1117_v14 = vpop.f32.mrf.mxu2 }
 0xa67   : > { %v2196_v15 = vadd.f32 %v1783_v13, %v1117_v14 }
 0xa69   : > { %1186 = vrot.lane.b32.xlu2 %v2196_v15, %s1853_s23  ;;  %1188 = vrot.lane.b32.xlu1 %v2196_v15, %s1849_s1  ;;  %s2428_s1 = smov 80   ;;  %s2429_s23 = smov 64  }
 0xa6a   : > { %1121 = vrot.lane.b32.xlu0 %v2196_v15, %s2426_s28  ;;  %s2438_s28 = sshll.u32 %s2440_s25, 3 }
 0xa71   : > { %1227 = vrot.lane.b32.xlu2 %v2196_v15, %s2427_s30 }
 0xac3   : > { %v1187_v16 = vpop.permute.xlu2 %1186 }
 0xacb   : > { %v1228_v19 = vpop.permute.xlu2 %1227 }
 0xadb   : > { %v1189_v17 = vpop.permute.xlu1 %1188 }
 0xadc   : > { %v1122_v18 = vpop.permute.xlu0 %1121  ;;  %1707 = vmatpush.xpose.msk.msrb.mxu2 %vm624_vm5, %v1189_v17  ;;  %v1717_v17 = vld [vmem:[%s2393_s5 + $0x28] sm:$0xff] }
 0xadd   : > { %1704 = vmatpush.xpose.msk.msra.mxu1 %vm624_vm5, %v1122_v18 }
 0xadf   : > { %1708 = vmatmul.msk.f32.vlgmr.msrb.gmra.mxu2 %vm624_vm5, %v1187_v16  ;;  %v1719_v16 = vld [vmem:[%s2393_s5 + $0x38] sm:$0xff] }
 0xae0   : > { %1705 = vmatmul.msk.f32.vlgmr.msra.gmra.mxu1 %vm624_vm5, %v2196_v15 }
 0xae1   : > { %1248 = vmatpush.msrb.mxu1 %v1228_v19 }
 0xb5d   : > { %v1144_v20 = vpop.f32.mrf.mxu1 }
 0xb5e   : > { %v1147_v21 = vmul.f32 0.35355338, %v1144_v20  ;;  %v1716_v20 = vld [vmem:[%s2393_s5 + $0x20] sm:$0xff] }
 0xb60   : > { %v1148_v22 = vsel %vm2024_vm6, %v1147_v21, -1e+30 }
 0xb61   : > { %v1149_v23 = vsel %vm624_vm5, %v1148_v22, -inf }
 0xb62   : > { %1150 = vmax.xlane.f32.xlu0 %v1149_v23  ;;  %v1211_v24 = vpop.f32.mrf.mxu2 }
 0xb63   : > { %v1214_v25 = vmul.f32 0.35355338, %v1211_v24 }
 0xb65   : > { %v1215_v26 = vsel %vm2024_vm6, %v1214_v25, -1e+30 }
 0xb66   : > { %v1216_v27 = vsel %vm624_vm5, %v1215_v26, -inf }
 0xb67   : > { %1217 = vmax.xlane.f32.xlu1 %v1216_v27  ;;  %v1784_v27 = vld [vmem:[%s2394_s6 + $0x1] ss:$0 sm:$0xff] }
 0xb76   : > { %1255 = vrot.lane.b32.xlu0 %v2196_v15, %s2428_s1 }
 0xb80   : > { %1160 = vrot.lane.b32.xlu1 %v2196_v15, %s2429_s23  ;;  %s543_s23 = scalar_lea.vmem %s2405_s17, %s2438_s28 }
 0xb88   : > { %1322 = vrot.lane.b32.xlu1 %v2196_v15, %s2430_s21  ;;  %s2436_s21 = smov 16  }
 0xbd5   : > { %v1151_v28 = vpop.xlane.xlu0 %1150 }
 0xbd6   : > { %v1152_v29 = vsub.f32 %v1148_v22, %v1151_v28 }
 0xbd8   : > { %v1153_v30 = vmul.f32 1.442695, %v1152_v29 }
 0xbda   : > { %1818 = vpow2.f32 %v1153_v30  ;;  %v1218_v31 = vpop.xlane.xlu1 %1217 }
 0xbdb   : > { %v1219_v32 = vsub.f32 %v1215_v26, %v1218_v31 }
 0xbdd   : > { %v1220_v33 = vmul.f32 1.442695, %v1219_v32 }
 0xbdf   : > { %1820 = vpow2.f32 %v1220_v33 }
 0xbe0   : > { %v1819_v34 = vpop.eup %1818 }
 0xbe1   : > { %v1155_v36 = vsel %vm624_vm5, %v1819_v34, 0.0 }
 0xbe2   : > { %1156 = vadd.xlane.f32.xlu2 %v1155_v36 }
 0xbe5   : > { %v1821_v37 = vpop.eup %1820 }
 0xbe6   : > { %v1222_v38 = vsel %vm624_vm5, %v1821_v37, 0.0 }
 0xbe7   : > { %1223 = vadd.xlane.f32.xlu0 %v1222_v38  ;;  %v1727_v38 = vld [vmem:[%s2397_s9 + $0x38] sm:$0xff] }
 0xbe8   : > { %v1256_v35 = vpop.permute.xlu0 %1255 }
 0xbf2   : > { %v1161_v39 = vpop.permute.xlu1 %1160 }
 0xbf3   : > { %1181 = vmatpush.msrb.mxu3 %v1161_v39  ;;  %v1725_v39 = vld [vmem:[%s2397_s9 + $0x28] sm:$0xff] }
 0xbf5   : > { %1710 = vmatpush.xpose.msk.msra.mxu3 %vm624_vm5, %v1256_v35  ;;  %v1724_v35 = vld [vmem:[%s2397_s9 + $0x20] sm:$0xff] }
 0xbfa   : > { %1320 = vrot.lane.b32.xlu2 %v2196_v15, %s2431_s0  ;;  %v1323_v40 = vpop.permute.xlu1 %1322  ;;  %s2437_s0 = smov 24  }
 0xbfb   : > { %1713 = vmatpush.xpose.msk.msra.mxu1 %vm624_vm5, %v1323_v40  ;;  %1253 = vrot.lane.b32.xlu0 %v2196_v15, %s2432_s18  ;;  %v1745_v40 = vld [vmem:[%s2399_s11 + $0xf8] sm:$0xff] }
 0xc55   : > { %v1157_v41 = vpop.xlane.xlu2 %1156 }
 0xc56   : > { %1822 = vrcp.f32 %v1157_v41  ;;  %v1744_v41 = vld [vmem:[%s2399_s11 + $0xf0] sm:$0xff] }
 0xc5a   : > { %v1224_v42 = vpop.xlane.xlu0 %1223 }
 0xc5b   : > { %1824 = vrcp.f32 %v1224_v42  ;;  %v1743_v42 = vld [vmem:[%s2399_s11 + $0xe8] sm:$0xff] }
 0xc5c   : > { %v1823_v43 = vpop.eup %1822 }
 0xc5d   : > { %v1159_v44 = vmul.f32 %v1823_v43, %v1819_v34  ;;  %v1321_v48 = vpop.permute.xlu2 %1320 }
 0xc5f   : > { %1706 = vmatmul.msk.f32.vlgmr.msrb.gmra.mxu3 %vm624_vm5, %v1159_v44 }
 0xc61   : > { %v1825_v45 = vpop.eup %1824 }
 0xc62   : > { %v1226_v46 = vmul.f32 %v1825_v45, %v1821_v37 }
 0xc64   : > { %1709 = vmatmul.msk.f32.vlgmr.msrb.gmra.mxu1 %vm624_vm5, %v1226_v46 }
 0xc65   : > { %1496 = vmatpush.msrb.mxu1 %v1727_v38 }
 0xc6c   : > { %1714 = vmatmul.msk.f32.vlgmr.msra.gmra.mxu1 %vm624_vm5, %v1321_v48 }
 0xc6d   : > { %v1254_v49 = vpop.permute.xlu0 %1253 }
 0xc6e   : > { %1711 = vmatmul.msk.f32.vlgmr.msra.gmra.mxu3 %vm624_vm5, %v1254_v49 }
 0xce1   : > { %v1250_v51 = vpop.f32.mrf.mxu1 }
 0xce2   : > { %v1183_v52 = vpop.f32.mrf.mxu3 }
 0xce9   : > { %v1345_v53 = vpop.f32.mrf.mxu1 }
 0xcea   : > { %v1348_v54 = vmul.f32 0.35355338, %v1345_v53 }
 0xcec   : > { %v1349_v56 = vsel %vm2024_vm6, %v1348_v54, -1e+30  ;;  %v1785_v54 = vld [vmem:[%s2395_s7 + $0x1] ss:$0 sm:$0xff] }
 0xced   : > { %v1350_v57 = vsel %vm624_vm5, %v1349_v56, -inf }
 0xcee   : > { %1351 = vmax.xlane.f32.xlu1 %v1350_v57 }
 0xcf1   : > { %v1278_v58 = vpop.f32.mrf.mxu3 }
 0xcf2   : > { %v1281_v55 = vmul.f32 0.35355338, %v1278_v58  ;;  %v1786_v58 = vld [vmem:[%s2396_s8 + $0x1] ss:$0 sm:$0xff] }
 0xcf4   : > { %v1282_v59 = vsel %vm2024_vm6, %v1281_v55, -1e+30 }
 0xcf5   : > { %v1283_v60 = vsel %vm624_vm5, %v1282_v59, -inf }
 0xcf6   : > { %1284 = vmax.xlane.f32.xlu0 %v1283_v60  ;;  %v1742_v60 = vld [vmem:[%s2399_s11 + $0xe0] sm:$0xff] }
 0xd07   : > { %1294 = vrot.lane.b32.xlu1 %v2196_v15, %s2433_s19 }
 0xd61   : > { %v1352_v61 = vpop.xlane.xlu1 %1351 }
 0xd62   : > { %v1353_v62 = vsub.f32 %v1349_v56, %v1352_v61  ;;  %v1741_v61 = vld [vmem:[%s2399_s11 + $0xd8] sm:$0xff] }
 0xd64   : > { %v1354_v0 = vmul.f32 1.442695, %v1353_v62  ;;  %v1740_v62 = vld [vmem:[%s2399_s11 + $0xd0] sm:$0xff] }
 0xd66   : > { %1826 = vpow2.f32 %v1354_v0  ;;  %v1739_v0 = vld [vmem:[%s2399_s11 + $0xc8] sm:$0xff] }
 0xd69   : > { %v1285_v63 = vpop.xlane.xlu0 %1284 }
 0xd6a   : > { %v1286_v1 = vsub.f32 %v1282_v59, %v1285_v63  ;;  %v1738_v63 = vld [vmem:[%s2399_s11 + $0xc0] sm:$0xff] }
 0xd6c   : > { %v1827_v2 = vpop.eup %1826  ;;  %v1287_v3 = vmul.f32 1.442695, %v1286_v1  ;;  %v1737_v1 = vld [vmem:[%s2399_s11 + $0xb8] sm:$0xff] }
 0xd6d   : > { %v1356_v4 = vsel %vm624_vm5, %v1827_v2, 0.0 }
 0xd6e   : > { %1828 = vpow2.f32 %v1287_v3  ;;  %1357 = vadd.xlane.f32.xlu0 %v1356_v4  ;;  %v1735_v3 = vld [vmem:[%s2399_s11 + $0xa8] sm:$0xff]  ;;  %v1734_v4 = vld [vmem:[%s2399_s11 + $0xa0] sm:$0xff] }
 0xd74   : > { %v1829_v47 = vpop.eup %1828 }
 0xd75   : > { %v1289_v5 = vsel %vm624_vm5, %v1829_v47, 0.0 }
 0xd76   : > { %1290 = vadd.xlane.f32.xlu2 %v1289_v5  ;;  %v1732_v5 = vld [vmem:[%s2399_s11 + $0x90] sm:$0xff] }
 0xd79   : > { %v1295_v6 = vpop.permute.xlu1 %1294 }
 0xd7a   : > { %1315 = vmatpush.msra.mxu2 %v1295_v6  ;;  %v1731_v6 = vld [vmem:[%s2399_s11 + $0x88] sm:$0xff] }
 0xd7c   : > { %1422 = vmatpush.msrb.mxu2 %v1719_v16 }
 0xd82   : > { %1388 = vrot.lane.b32.xlu0 %v1250_v51, %s2434_s26 }
 0xd8e   : > { %1361 = vrot.lane.b32.xlu2 %v2196_v15, %s2435_s20  ;;  %v1718_v15 = vld [vmem:[%s2393_s5 + $0x30] sm:$0xff] }
 0xd8f   : > { %1423 = vmatpush.msrb.mxu2 %v1718_v15 }
 0xd91   : > { %1424 = vmatpush.msrb.mxu2 %v1717_v17 }
 0xd93   : > { %1425 = vmatpush.msrb.mxu2 %v1716_v20 }
 0xde1   : > { %v1358_v7 = vpop.xlane.xlu0 %1357 }
 0xde2   : > { %1830 = vrcp.f32 %v1358_v7  ;;  %v1730_v7 = vld [vmem:[%s2399_s11 + $0x80] sm:$0xff] }
 0xde8   : > { %v1831_v10 = vpop.eup %1830 }
 0xde9   : > { %v1291_v9 = vpop.xlane.xlu2 %1290  ;;  %v1360_v12 = vmul.f32 %v1831_v10, %v1827_v2  ;;  %v1736_v2 = vld [vmem:[%s2399_s11 + $0xb0] sm:$0xff] }
 0xdea   : > { %1832 = vrcp.f32 %v1291_v9  ;;  %v1787_v9 = vld [vmem:[%s2398_s10 + $0x1] ss:$0 sm:$0xff] }
 0xdf0   : > { %v1833_v11 = vpop.eup %1832 }
 0xdf1   : > { %v1293_v13 = vmul.f32 %v1833_v11, %v1829_v47  ;;  %v1362_v14 = vpop.permute.xlu2 %1361  ;;  %v1733_v47 = vld [vmem:[%s2399_s11 + $0x98] sm:$0xff] }
 0xdf2   : > { %1382 = vmatpush.msrb.mxu3 %v1362_v14 }
 0xdf3   : > { %1712 = vmatmul.msk.f32.vlgmr.msra.gmra.mxu2 %vm624_vm5, %v1293_v13  ;;  %1715 = vmatmul.msk.f32.vlgmr.msrb.gmra.mxu3 %vm624_vm5, %v1360_v12 }
 0xdf4   : > { %v1389_v21 = vpop.permute.xlu0 %1388  ;;  %1530 = vmatpush.msra.mxu3 %v1745_v40 }
 0xdf5   : > { %v1399_v22 = vsel %vm624_vm5, %v1183_v52, %v1389_v21  ;;  %v1788_v21 = vld [vmem:[%s2400_s12 + $0x1] ss:$0 sm:$0xff] }
 0xdf6   : > { %1531 = vmatpush.msra.mxu3 %v1744_v41 }
 0xdf8   : > { %1532 = vmatpush.msra.mxu3 %v1743_v42 }
 0xdfa   : > { %1533 = vmatpush.msra.mxu3 %v1742_v60 }
 0xdfc   : > { %1534 = vmatpush.msra.mxu3 %v1741_v61 }
 0xdfe   : > { %1535 = vmatpush.msra.mxu3 %v1740_v62 }
 0xe00   : > { %1536 = vmatpush.msra.mxu3 %v1739_v0 }
 0xe02   : > { %1537 = vmatpush.msra.mxu3 %v1738_v63 }
 0xe04   : > { %1538 = vmatpush.msra.mxu3 %v1737_v1 }
 0xe06   : > { %1539 = vmatpush.msra.mxu3 %v1736_v2 }
 0xe08   : > { %1540 = vmatpush.msra.mxu3 %v1735_v3 }
 0xe0a   : > { %1541 = vmatpush.msra.mxu3 %v1734_v4 }
 0xe0c   : > { %1542 = vmatpush.msra.mxu3 %v1733_v47 }
 0xe0e   : > { %1543 = vmatpush.msra.mxu3 %v1732_v5 }
 0xe10   : > { %1544 = vmatpush.msra.mxu3 %v1731_v6 }
 0xe12   : > { %1545 = vmatpush.msra.mxu3 %v1730_v7 }
 0xe76   : > { %v1317_v18 = vpop.f32.mrf.mxu2  ;;  %v1384_v19 = vpop.f32.mrf.mxu3 }
 0xe77   : > { %1392 = vrot.lane.b32.xlu0 %v1317_v18, %s2436_s21  ;;  %1396 = vrot.lane.b32.xlu1 %v1384_v19, %s2437_s0 }
 0xee9   : > { %v1397_v23 = vpop.permute.xlu1 %1396  ;;  %v1393_v24 = vpop.permute.xlu0 %1392 }
 0xeea   : > { %v1400_v25 = vsel %vm902_vm7, %v1399_v22, %v1393_v24 }
 0xeeb   : > { %v1401_v26 = vsel %vm904_vm8, %v1400_v25, %v1397_v23 }
 0xeec   : > { %1720 = vmatmul.msk.f32.vlgmr.msrb.gmra.mxu2 %vm552_vm0, %v1401_v26 }
 0xf6f   : > { %v1427_v28 = vpop.f32.mrf.mxu2 }
 0xf70   : > { %v1430_v29 = vadd.f32 %v1427_v28, %v2166_v50  ;;  %v1726_v50 = vld [vmem:[%s2397_s9 + $0x30] sm:$0xff] }
 0xf71   : > { %1497 = vmatpush.msrb.mxu1 %v1726_v50 }
 0xf72   : > { %v2272_v30 = vadd.f32 %v1784_v27, %v1430_v29 }
 0xf73   : > { %1498 = vmatpush.msrb.mxu1 %v1725_v39 }
 0xf74   : > { %v1441_v31 = vsel %vm552_vm0, %v2272_v30, 0.0 }
 0xf75   : > { %1442 = vadd.xlane.f32.xlu2 %v1441_v31  ;;  %1499 = vmatpush.msrb.mxu1 %v1724_v35 }
 0xfe8   : > { %v1443_v32 = vpop.xlane.xlu2 %1442 }
 0xfe9   : > { %v1444_v33 = vmul.f32 %v1443_v32, %v1973_v8  ;;  %v1592_v32 = vld [vmem:[%s2403_s15 + $0x18] sm:$0xff] }
 0xfea   : > { %1612 = vmatpush.msrb.mxu0 %v1592_v32 }
 0xfeb   : > { %v1445_v34 = vsub.f32 %v2272_v30, %v1444_v33  ;;  %v1590_v33 = vld [vmem:[%s2403_s15 + $0x8] sm:$0xff] }
 0xfed   : > { %v1446_v36 = vmul.f32 %v1445_v34, %v1445_v34 }
 0xfef   : > { %v1447_v37 = vsel %vm552_vm0, %v1446_v36, 0.0 }
 0xff0   : > { %1448 = vadd.xlane.f32.xlu0 %v1447_v37 }
0x1063   : > { %v1449_v43 = vpop.xlane.xlu0 %1448 }
0x1064   : > { %v1450_v44 = vmul.f32 %v1449_v43, %v1973_v8  ;;  %v1789_v43 = vld [vmem:[%s2401_s13] ss:$0 sm:$0xff] }
0x1066   : > { %v1451_v45 = vadd.f32 1e-05, %v1450_v44 }
0x1068   : > { %1834 = vrsqrt.f32 %v1451_v45  ;;  %vm1458_vm1 = vweird.f32 %v1451_v45 }
0x106e   : > { %v1835_v46 = vpop.eup %1834 }
0x106f   : > { %v1453_v48 = vmul.f32 %v1835_v46, %v1451_v45  ;;  %vm1459_vm15 = vweird.f32 %v1835_v46 }
0x1070   : > { %vm1460_vm2 = vmor %vm1458_vm1, %vm1459_vm15 }
0x1071   : > { %v1454_v49 = vmul.f32 %v1835_v46, %v1453_v48 }
0x1073   : > { %v1455_v51 = vmul.f32 0.5, %v1454_v49  ;;  %v1791_v49 = vld [vmem:[%s2404_s16] ss:$0 sm:$0xff] }
0x1075   : > { %v1456_v52 = vsub.f32 1.5, %v1455_v51 }
0x1077   : > { %v1457_v53 = vmul.f32 %v1835_v46, %v1456_v52 }
0x1079   : > { %v1461_v56 = vsel %vm1460_vm2, %v1835_v46, %v1457_v53 }
0x107a   : > { %v1462_v57 = vmul.f32 %v1461_v56, %v1445_v34  ;;  %v1589_v34 = vld [vmem:[%s2403_s15] sm:$0xff] }
0x107c   : > { %v1466_v55 = vmul.f32 %v1785_v54, %v1462_v57 }
0x107e   : > { %v1470_v59 = vadd.f32 %v1786_v58, %v1466_v55 }
0x1080   : > { %1729 = vmatmul.msk.f32.vlgmr.msrb.gmra.mxu1 %vm552_vm0, %v1470_v59 }
0x10fd   : > { %v1501_v10 = vpop.f32.mrf.mxu1 }
0x10fe   : > { %v1502_v11 = vadd.f32 %v1787_v9, %v1501_v10 }
0x1100   : > { %v1504_v12 = vmul.f32 %v1502_v11, %v1502_v11 }
0x1102   : > { %v1505_v13 = vmul.f32 %v1504_v12, %v1502_v11 }
0x1104   : > { %v1506_v14 = vmul.f32 0.044715, %v1505_v13 }
0x1106   : > { %v1507_v16 = vadd.f32 %v1506_v14, %v1502_v11 }
0x1108   : > { %v1508_v15 = vmul.f32 0.7978846, %v1507_v16 }
0x110a   : > { %1836 = vtanh.f32 %v1508_v15 }
0x1110   : > { %v1837_v17 = vpop.eup %1836 }
0x1111   : > { %v1510_v18 = vadd.f32 1.0, %v1837_v17 }
0x1113   : > { %v1511_v19 = vmul.f32 0.5, %v1510_v18 }
0x1115   : > { %v1512_v20 = vmul.f32 %v1511_v19, %v1502_v11 }
0x1117   : > { %1546 = vmatmul.f32.vlgmr.msra.gmra.mxu3 %v1512_v20 }
0x119a   : > { %v1547_v22 = vpop.f32.mrf.mxu3 }
0x119b   : > { %v1550_v23 = vadd.f32 %v1547_v22, %v2272_v30  ;;  %v1591_v30 = vld [vmem:[%s2403_s15 + $0x10] sm:$0xff] }
0x119c   : > { %1613 = vmatpush.msrb.mxu0 %v1591_v30 }
0x119d   : > { %v1556_v24 = vadd.f32 %v1788_v21, %v1550_v23 }
0x119e   : > { %1614 = vmatpush.msrb.mxu0 %v1590_v33 }
0x119f   : > { %v1559_v25 = vsel %vm552_vm0, %v1556_v24, 0.0 }
0x11a0   : > { %1560 = vadd.xlane.f32.xlu1 %v1559_v25  ;;  %1615 = vmatpush.msrb.mxu0 %v1589_v34 }
0x1213   : > { %v1561_v26 = vpop.xlane.xlu1 %1560 }
0x1214   : > { %v1562_v27 = vmul.f32 %v1561_v26, %v1973_v8 }
0x1216   : > { %v1563_v28 = vsub.f32 %v1556_v24, %v1562_v27 }
0x1218   : > { %v1564_v29 = vmul.f32 %v1563_v28, %v1563_v28 }
0x121a   : > { %v1565_v31 = vsel %vm552_vm0, %v1564_v29, 0.0 }
0x121b   : > { %1566 = vadd.xlane.f32.xlu2 %v1565_v31 }
0x128e   : > { %v1567_v36 = vpop.xlane.xlu2 %1566 }
0x128f   : > { %v1568_v37 = vmul.f32 %v1567_v36, %v1973_v8  ;;  %v1790_v8 = vld [vmem:[%s2402_s14] ss:$0 sm:$0xff] }
0x1291   : > { %v1569_v38 = vadd.f32 1e-05, %v1568_v37 }
0x1293   : > { %1838 = vrsqrt.f32 %v1569_v38  ;;  %vm1576_vm4 = vweird.f32 %v1569_v38 }
0x1299   : > { %v1839_v50 = vpop.eup %1838 }
0x129a   : > { %v1571_v39 = vmul.f32 %v1839_v50, %v1569_v38  ;;  %vm1577_vm3 = vweird.f32 %v1839_v50 }
0x129b   : > { %vm1578_vm5 = vmor %vm1576_vm4, %vm1577_vm3 }
0x129c   : > { %v1572_v35 = vmul.f32 %v1839_v50, %v1571_v39 }
0x129e   : > { %v1573_v40 = vmul.f32 0.5, %v1572_v35 }
0x12a0   : > { %v1574_v41 = vsub.f32 1.5, %v1573_v40 }
0x12a2   : > { %v1575_v42 = vmul.f32 %v1839_v50, %v1574_v41 }
0x12a4   : > { %v1579_v44 = vsel %vm1578_vm5, %v1839_v50, %v1575_v42 }
0x12a5   : > { %v1580_v45 = vmul.f32 %v1579_v44, %v1563_v28 }
0x12a7   : > { %v1584_v46 = vmul.f32 %v1789_v43, %v1580_v45 }
0x12a9   : > { %v1588_v48 = vadd.f32 %v1790_v8, %v1584_v46 }
0x12ab   : > { %1747 = vmatmul.msk.f32.vlgmr.msrb.gmra.mxu0 %vm552_vm0, %v1588_v48 }
0x1328   : > { %v1617_v51 = vpop.f32.mrf.mxu0 }
0x1329   : > { %v1618_v52 = vadd.f32 %v1791_v49, %v1617_v51 }
0x132b   : > { %1620 = vst [vmem:[%s543_s23] sm:$0xff] %v1618_v52 }
0x132c PF: > { %s27_s24 = sadd.s32 1, %s1846_s24  }
0x132d   : > { %p24_p4 = scmp.ge.s32.totalorder %s27_s24, 4  }
0x132f   :  { %26 = sbr.rel (!%p24_p4) target bundleno = 3 (0x3), region = 130 }

</bundles_post_ra>
